<compile_context>
chip_gen: v7x
topology: tpu7x:2x2x1
jax: 0.10.0
libtpu: 0.0.40
codegen_flags: <defaults>
</compile_context>

<pallas_src>
import functools
import math

import jax
import jax.numpy as jnp
from jax.experimental import pallas as pl
from jax.experimental.pallas import tpu as pltpu


def _rho_k(k, *, mxu_rowsum):
    """softmax over the feature (lane) axis of a (tile_n, Dk) f32 tile.

    The row max stays on the XLU (needed for numerical safety); the row sum is
    optionally computed on the MXU (k_exp @ ones) — exact, and the MXU has
    large slack in this kernel while the XLU is the binding slot on v7x.
    """
    k = jnp.exp(k - jnp.max(k, axis=-1, keepdims=True))
    if mxu_rowsum:
        dk = k.shape[-1]
        ones_mat = jnp.ones((dk, dk), dtype=k.dtype)
        ksum = jax.lax.dot_general(
            k, ones_mat,
            dimension_numbers=(((1,), (0,)), ((), ())),
            preferred_element_type=jnp.float32)          # (tile_n, Dk), cols equal
    else:
        ksum = jnp.sum(k, axis=-1, keepdims=True)        # (tile_n, 1)
    return k * pl.reciprocal(ksum, approx=False)


def _ctx_stats_kernel(q_ref, k_ref, v_ref, ctx_ref, lse_ref,
                      acc_sc, m_sc, s_sc, *,
                      scale, seq_len, tile_n, ragged, mxu_rowsum, compute_dtype):
    """Pass 1: accumulate ctx = rho_k(K)^T @ V and global rho_q column logsumexp."""
    nt = pl.program_id(1)

    @pl.when(nt == 0)
    def _init():
        acc_sc[...] = jnp.zeros_like(acc_sc)
        m_sc[...] = jnp.full_like(m_sc, -jnp.inf)
        s_sc[...] = jnp.zeros_like(s_sc)

    q = q_ref[0].astype(jnp.float32) * scale             # (tile_n, Dk)
    k = k_ref[0].astype(jnp.float32) * scale             # (tile_n, Dk)
    v = v_ref[0].astype(compute_dtype)                   # (tile_n, Dv)

    if ragged:
        # Mask the out-of-bounds rows of the last partial tile.  K/V rows must
        # be zeroed BEFORE exp / the MXU accumulate (garbage -> inf*0 -> NaN);
        # Q rows go to -1e30 so exp(q - m) == 0 and the stats are untouched.
        row = (jax.lax.broadcasted_iota(jnp.int32, (tile_n, 1), 0)
               + nt * tile_n)
        valid = row < seq_len
        q = jnp.where(valid, q, -1e30)
        k = jnp.where(valid, k, 0.0)
        v = jnp.where(valid, v, jnp.zeros_like(v))

    # rho_k: softmax over the feature axis (row-local -> tiles exactly over N).
    k = _rho_k(k, mxu_rowsum=mxu_rowsum)

    # ctx += rho_k(K_tile)^T @ V_tile : contract the sequence axis (axis 0 of
    # both operands) directly on the MXU, f32 accumulate.
    acc_sc[...] += jax.lax.dot_general(
        k.astype(compute_dtype), v,
        dimension_numbers=(((0,), (0,)), ((), ())),
        preferred_element_type=jnp.float32)

    # Online (across N tiles) column max / sum-exp for rho_q.
    m_tile = jnp.max(q, axis=0, keepdims=True)           # (1, Dk)
    m_new = jnp.maximum(m_sc[...], m_tile)
    s_sc[...] = (s_sc[...] * jnp.exp(m_sc[...] - m_new)
                 + jnp.sum(jnp.exp(q - m_new), axis=0, keepdims=True))
    m_sc[...] = m_new

    @pl.when(nt == pl.num_programs(1) - 1)
    def _finalize():
        ctx_ref[0] = acc_sc[...].astype(ctx_ref.dtype)
        # Fold the normalizer into a logsumexp: pass 2 only needs exp(q - lse),
        # no per-element 1/s multiply and one fewer HBM input stream.
        lse_ref[0] = m_sc[...] + jnp.log(s_sc[...])


def _out_kernel(q_ref, ctx_ref, lse_ref, o_ref, *,
                scale, seq_len, tile_n, ragged, compute_dtype):
    """Pass 2: out_tile = exp(Q_tile*scale - lse) @ ctx."""
    q = q_ref[0].astype(jnp.float32) * scale              # (tile_n, Dk)
    if ragged:
        nt = pl.program_id(1)
        row = (jax.lax.broadcasted_iota(jnp.int32, (tile_n, 1), 0)
               + nt * tile_n)
        q = jnp.where(row < seq_len, q, -1e30)            # OOB rows -> p == 0
    p = jnp.exp(q - lse_ref[0])                            # normalized rho_q tile
    out = jnp.dot(p.astype(compute_dtype), ctx_ref[0].astype(compute_dtype),
                  preferred_element_type=jnp.float32)
    o_ref[0] = out.astype(o_ref.dtype)


def _fused_kernel(q_ref, k_ref, v_ref, o_ref, *, scale, mxu_rowsum, compute_dtype):
    """Single-tile fast path: both passes fused, ctx/stats never leave VMEM."""
    q = q_ref[0].astype(jnp.float32) * scale
    k = k_ref[0].astype(jnp.float32) * scale
    v = v_ref[0].astype(compute_dtype)

    k = _rho_k(k, mxu_rowsum=mxu_rowsum)
    ctx = jax.lax.dot_general(
        k.astype(compute_dtype), v,
        dimension_numbers=(((0,), (0,)), ((), ())),
        preferred_element_type=jnp.float32)                # (Dk, Dv) f32

    m = jnp.max(q, axis=0, keepdims=True)                  # rho_q over N (axis 0)
    e = jnp.exp(q - m)
    p = e * pl.reciprocal(jnp.sum(e, axis=0, keepdims=True), approx=False)
    out = jnp.dot(p.astype(compute_dtype), ctx.astype(compute_dtype),
                  preferred_element_type=jnp.float32)
    o_ref[0] = out.astype(o_ref.dtype)


def _vmem_capacity_bytes():
    try:
        info = pltpu.get_tpu_info()
        cap = getattr(info, "vmem_capacity_bytes", None)
        if cap:
            return int(cap)
    except Exception:
        pass
    return 128 * 1024 * 1024


def _choose_tile_n(N, Dk, Dv, itemsize):
    # Generation-aware: budget a slice of physical VMEM for the double-buffered
    # Q/K/V tiles PLUS the f32 in-kernel temporaries (q/k/exp copies), staying
    # under the default scoped limits (16 MiB v5e / 32 MiB v6e / 32-of-64 v7x).
    cap = _vmem_capacity_bytes()
    budget = min(cap // 8, 12 * 1024 * 1024)
    per_row = 2 * (2 * Dk + Dv) * itemsize        # Q, K, V, double-buffered
    per_row += 4 * max(Dk, Dv) * 4                # f32 temporaries in the body
    t = int(budget // max(per_row, 1))
    t = max(256, min(t, 2048))
    t = (t // 256) * 256                          # multiple of 256 (MXU depth, 8/16 sublane)
    return N if N <= t else t


def efficient_attention(Q, K, V, *, tile_n=None, mxu_rowsum=None):
    """Pallas TPU implementation of EfficientAttention.forward(Q, K, V)."""
    B, N, Dk = Q.shape
    Bv, Nv, Dv = V.shape
    assert (B, N) == (Bv, Nv) and K.shape == (B, N, Dk)

    scale = 1.0 / math.sqrt(Dk)
    out_dtype = Q.dtype
    # MXU operand dtype: all-bf16 inputs -> bf16 MXU (f32 accumulate);
    # mixed f32/bf16 inputs promote to f32 (no silent downcast).
    compute_dtype = jnp.promote_types(jnp.promote_types(Q.dtype, K.dtype), V.dtype)
    if mxu_rowsum is None:
        mxu_rowsum = Dk >= 128        # lane reductions only hurt at lane-width Dk

    itemsize = max(jnp.dtype(Q.dtype).itemsize, jnp.dtype(V.dtype).itemsize)
    if tile_n is None:
        tile_n = _choose_tile_n(N, Dk, Dv, itemsize)
    tile_n = int(tile_n)

    vmem_limit = int(min(_vmem_capacity_bytes() // 2, 64 * 1024 * 1024))

    # ---- Single-tile fast path: fuse both passes; ctx/stats stay in VMEM ----
    if tile_n >= N:
        # TODO(synk): on v7x (2 TensorCores) a B==1 call leaves one core idle;
        # a 2-way N split with a tiny merge step would recover it.
        return pl.pallas_call(
            functools.partial(_fused_kernel, scale=scale,
                              mxu_rowsum=mxu_rowsum, compute_dtype=compute_dtype),
            out_shape=jax.ShapeDtypeStruct((B, N, Dv), out_dtype),
            grid_spec=pltpu.PrefetchScalarGridSpec(
                num_scalar_prefetch=0,
                grid=(B,),
                in_specs=[
                    pl.BlockSpec((1, N, Dk), lambda b: (b, 0, 0)),
                    pl.BlockSpec((1, N, Dk), lambda b: (b, 0, 0)),
                    pl.BlockSpec((1, N, Dv), lambda b: (b, 0, 0)),
                ],
                out_specs=pl.BlockSpec((1, N, Dv), lambda b: (b, 0, 0)),
            ),
            compiler_params=pltpu.CompilerParams(
                dimension_semantics=("parallel",),
                vmem_limit_bytes=vmem_limit,
            ),
        )(Q, K, V)

    # ---- Multi-tile path --------------------------------------------------
    tile_n = max(8, (tile_n // 8) * 8)             # sublane-aligned tiles
    n_tiles = -(-N // tile_n)                      # cdiv: no jnp.pad, no out slice
    ragged = (N % tile_n) != 0                     # last tile masked in-kernel

    # Pass 1: ctx accumulation + global rho_q column logsumexp.
    ctx, lse = pl.pallas_call(
        functools.partial(_ctx_stats_kernel, scale=scale, seq_len=N,
                          tile_n=tile_n, ragged=ragged,
                          mxu_rowsum=mxu_rowsum, compute_dtype=compute_dtype),
        out_shape=(
            jax.ShapeDtypeStruct((B, Dk, Dv), jnp.float32),   # f32: no bf16 round trip
            jax.ShapeDtypeStruct((B, 1, Dk), jnp.float32),
        ),
        grid_spec=pltpu.PrefetchScalarGridSpec(
            num_scalar_prefetch=0,
            grid=(B, n_tiles),
            in_specs=[
                pl.BlockSpec((1, tile_n, Dk), lambda b, n: (b, n, 0)),
                pl.BlockSpec((1, tile_n, Dk), lambda b, n: (b, n, 0)),
                pl.BlockSpec((1, tile_n, Dv), lambda b, n: (b, n, 0)),
            ],
            out_specs=[
                pl.BlockSpec((1, Dk, Dv), lambda b, n: (b, 0, 0)),
                pl.BlockSpec((1, 1, Dk), lambda b, n: (b, 0, 0)),
            ],
            scratch_shapes=[
                pltpu.VMEM((Dk, Dv), jnp.float32),   # ctx accumulator
                pltpu.VMEM((1, Dk), jnp.float32),    # running column max
                pltpu.VMEM((1, Dk), jnp.float32),    # running column sum-exp
            ],
        ),
        compiler_params=pltpu.CompilerParams(
            dimension_semantics=("parallel", "arbitrary"),
            vmem_limit_bytes=vmem_limit,
        ),
    )(Q, K, V)

    # Pass 2: out = exp(Q*scale - lse) @ ctx  (both grid axes parallel).
    out = pl.pallas_call(
        functools.partial(_out_kernel, scale=scale, seq_len=N, tile_n=tile_n,
                          ragged=ragged, compute_dtype=compute_dtype),
        out_shape=jax.ShapeDtypeStruct((B, N, Dv), out_dtype),
        grid_spec=pltpu.PrefetchScalarGridSpec(
            num_scalar_prefetch=0,
            grid=(B, n_tiles),
            in_specs=[
                pl.BlockSpec((1, tile_n, Dk), lambda b, n: (b, n, 0)),
                pl.BlockSpec((1, Dk, Dv), lambda b, n: (b, 0, 0)),
                pl.BlockSpec((1, 1, Dk), lambda b, n: (b, 0, 0)),
            ],
            out_specs=pl.BlockSpec((1, tile_n, Dv), lambda b, n: (b, n, 0)),
        ),
        compiler_params=pltpu.CompilerParams(
            dimension_semantics=("parallel", "parallel"),
            vmem_limit_bytes=vmem_limit,
        ),
    )(Q, ctx, lse)

    return out


def _reference(Q, K, V):
    d_k = Q.shape[-1]
    q = jax.nn.softmax(Q / math.sqrt(d_k), axis=-2)
    k = jax.nn.softmax(K / math.sqrt(d_k), axis=-1)
    return q @ (jnp.swapaxes(k, -2, -1) @ V)


if __name__ == "__main__":
    key = jax.random.PRNGKey(0)

    # Case 1: ragged multi-tile path (N=320, tile 128 -> in-kernel masking of
    # the partial last tile; no jnp.pad / output slice).
    k1, k2, k3, key = jax.random.split(key, 4)
    B, N, Dk, Dv = 2, 320, 128, 128
    Q = jax.random.normal(k1, (B, N, Dk), dtype=jnp.float32)
    K = jax.random.normal(k2, (B, N, Dk), dtype=jnp.float32)
    V = jax.random.normal(k3, (B, N, Dv), dtype=jnp.float32)
    out = jax.block_until_ready(efficient_attention(Q, K, V, tile_n=128))
    ref = _reference(Q, K, V)
    assert out.shape == ref.shape
    assert jnp.allclose(out, ref, atol=2e-5, rtol=2e-5), "mismatch (ragged tiled f32)"

    # Case 2: small module-scale shapes -> fused single-kernel path.
    k1, k2, k3, key = jax.random.split(key, 4)
    B, N, Dk, Dv = 2, 16, 32, 32
    Q = jax.random.normal(k1, (B, N, Dk), dtype=jnp.float32)
    K = jax.random.normal(k2, (B, N, Dk), dtype=jnp.float32)
    V = jax.random.normal(k3, (B, N, Dv), dtype=jnp.float32)
    out = jax.block_until_ready(efficient_attention(Q, K, V))
    ref = _reference(Q, K, V)
    assert out.shape == ref.shape
    assert jnp.allclose(out, ref, atol=2e-5, rtol=2e-5), "mismatch (fused small f32)"

    # Case 3: bf16 inputs, evenly tiled multi-tile path (bf16 MXU operands,
    # f32 statistics and accumulation).
    k1, k2, k3, key = jax.random.split(key, 4)
    B, N, Dk, Dv = 2, 384, 128, 128
    Q = jax.random.normal(k1, (B, N, Dk), dtype=jnp.bfloat16)
    K = jax.random.normal(k2, (B, N, Dk), dtype=jnp.bfloat16)
    V = jax.random.normal(k3, (B, N, Dv), dtype=jnp.bfloat16)
    out = jax.block_until_ready(efficient_attention(Q, K, V, tile_n=128))
    ref = _reference(Q.astype(jnp.float32), K.astype(jnp.float32),
                     V.astype(jnp.float32))
    assert out.shape == ref.shape
    assert jnp.allclose(out.astype(jnp.float32), ref, atol=2e-2, rtol=2e-2), \
        "mismatch (bf16 tiled)"

    print("KERNEL_OK")
</pallas_src>

<mosaic_0001>
module attributes {stable_mosaic.version = 11 : i64} {
  func.func @_ctx_stats_kernel(%arg0: i32, %arg1: i32, %arg2: memref<1x128x128xf32, #tpu.memory_space<vmem>>, %arg3: memref<1x128x128xf32, #tpu.memory_space<vmem>>, %arg4: memref<1x128x128xf32, #tpu.memory_space<vmem>>, %arg5: memref<1x128x128xf32, #tpu.memory_space<vmem>>, %arg6: memref<1x1x128xf32, #tpu.memory_space<vmem>>, %arg7: memref<128x128xf32, #tpu.memory_space<vmem>>, %arg8: memref<1x128xf32, #tpu.memory_space<vmem>>, %arg9: memref<1x128xf32, #tpu.memory_space<vmem>>) attributes {dimension_semantics = [#tpu.dimension_semantics<parallel>, #tpu.dimension_semantics<arbitrary>], iteration_bounds = array<i64: 2, 3>, scalar_prefetch = 0 : i64, scratch_operands = 3 : i64, tpu.core_type = #tpu.core_type<tc>, window_params = [{transform_indices = @transform_0, window_bounds = array<i64: 1, 128, 128>}, {transform_indices = @transform_1, window_bounds = array<i64: 1, 128, 128>}, {transform_indices = @transform_2, window_bounds = array<i64: 1, 128, 128>}, {transform_indices = @transform_3, window_bounds = array<i64: 1, 128, 128>}, {transform_indices = @transform_4, window_bounds = array<i64: 1, 1, 128>}]} {
    %c0_i32 = arith.constant 0 : i32
    %0 = arith.cmpi eq, %arg1, %c0_i32 : i32
    %1 = arith.extui %0 : i1 to i32
    %c0_i32_0 = arith.constant 0 : i32
    %2 = arith.cmpi ne, %1, %c0_i32_0 : i32
    scf.if %2 {
      %cst_34 = arith.constant 0.000000e+00 : f32
      %64 = vector.broadcast %cst_34 : f32 to vector<128x128xf32>
      %c0_35 = arith.constant 0 : index
      %c0_36 = arith.constant 0 : index
      %65 = vector.load %arg7[%c0_35, %c0_36] : memref<128x128xf32, #tpu.memory_space<vmem>>, vector<128x128xf32>
      tpu.vector_store %arg7[%c0_35, %c0_36], %64 {strides = array<i32>} : memref<128x128xf32, #tpu.memory_space<vmem>>, vector<128x128xf32>,
      %cst_37 = arith.constant 0xFF800000 : f32
      %66 = vector.broadcast %cst_37 : f32 to vector<1x128xf32>
      %c0_38 = arith.constant 0 : index
      %c0_39 = arith.constant 0 : index
      %67 = vector.load %arg8[%c0_38, %c0_39] : memref<1x128xf32, #tpu.memory_space<vmem>>, vector<1x128xf32>
      tpu.vector_store %arg8[%c0_38, %c0_39], %66 {strides = array<i32>} : memref<1x128xf32, #tpu.memory_space<vmem>>, vector<1x128xf32>,
      %cst_40 = arith.constant 0.000000e+00 : f32
      %68 = vector.broadcast %cst_40 : f32 to vector<1x128xf32>
      %c0_41 = arith.constant 0 : index
      %c0_42 = arith.constant 0 : index
      %69 = vector.load %arg9[%c0_41, %c0_42] : memref<1x128xf32, #tpu.memory_space<vmem>>, vector<1x128xf32>
      tpu.vector_store %arg9[%c0_41, %c0_42], %68 {strides = array<i32>} : memref<1x128xf32, #tpu.memory_space<vmem>>, vector<1x128xf32>,
    } else {
    }
    %c0 = arith.constant 0 : index
    %c0_1 = arith.constant 0 : index
    %c0_2 = arith.constant 0 : index
    %3 = vector.load %arg2[%c0, %c0_1, %c0_2] : memref<1x128x128xf32, #tpu.memory_space<vmem>>, vector<1x128x128xf32>
    %4 = vector.shape_cast %3 : vector<1x128x128xf32> to vector<128x128xf32>
    %cst = arith.constant 0.0883883461 : f32
    %5 = vector.broadcast %cst : f32 to vector<128x128xf32>
    %6 = arith.mulf %4, %5 : vector<128x128xf32>
    %c0_3 = arith.constant 0 : index
    %c0_4 = arith.constant 0 : index
    %c0_5 = arith.constant 0 : index
    %7 = vector.load %arg3[%c0_3, %c0_4, %c0_5] : memref<1x128x128xf32, #tpu.memory_space<vmem>>, vector<1x128x128xf32>
    %8 = vector.shape_cast %7 : vector<1x128x128xf32> to vector<128x128xf32>
    %cst_6 = arith.constant 0.0883883461 : f32
    %9 = vector.broadcast %cst_6 : f32 to vector<128x128xf32>
    %10 = arith.mulf %8, %9 : vector<128x128xf32>
    %c0_7 = arith.constant 0 : index
    %c0_8 = arith.constant 0 : index
    %c0_9 = arith.constant 0 : index
    %11 = vector.load %arg4[%c0_7, %c0_8, %c0_9] : memref<1x128x128xf32, #tpu.memory_space<vmem>>, vector<1x128x128xf32>
    %12 = vector.shape_cast %11 : vector<1x128x128xf32> to vector<128x128xf32>
    %13 = tpu.iota {dimensions = array<i32: 0>} : vector<128x1xi32>
    %c128_i32 = arith.constant 128 : i32
    %14 = arith.muli %arg1, %c128_i32 : i32
    %15 = vector.broadcast %14 : i32 to vector<128x1xi32>
    %16 = arith.addi %13, %15 : vector<128x1xi32>
    %c320_i32 = arith.constant 320 : i32
    %17 = vector.broadcast %c320_i32 : i32 to vector<128x1xi32>
    %18 = arith.cmpi slt, %16, %17 : vector<128x1xi32>
    %cst_10 = arith.constant -1.000000e+30 : f32
    %19 = vector.shape_cast %18 : vector<128x1xi1> to vector<128x1xi1>
    %20 = vector.broadcast %19 : vector<128x1xi1> to vector<128x128xi1>
    %21 = vector.broadcast %cst_10 : f32 to vector<128x128xf32>
    %22 = arith.select %20, %6, %21 : vector<128x128xi1>, vector<128x128xf32>
    %cst_11 = arith.constant 0.000000e+00 : f32
    %23 = vector.shape_cast %18 : vector<128x1xi1> to vector<128x1xi1>
    %24 = vector.broadcast %23 : vector<128x1xi1> to vector<128x128xi1>
    %25 = vector.broadcast %cst_11 : f32 to vector<128x128xf32>
    %26 = arith.select %24, %10, %25 : vector<128x128xi1>, vector<128x128xf32>
    %cst_12 = arith.constant 0.000000e+00 : f32
    %27 = vector.broadcast %cst_12 : f32 to vector<128x128xf32>
    %28 = vector.shape_cast %18 : vector<128x1xi1> to vector<128x1xi1>
    %29 = vector.broadcast %28 : vector<128x1xi1> to vector<128x128xi1>
    %30 = arith.select %29, %12, %27 : vector<128x128xi1>, vector<128x128xf32>
    %cst_13 = arith.constant dense<0xFF800000> : vector<128xf32>
    %31 = vector.multi_reduction <maximumf>, %26, %cst_13 [1] : vector<128x128xf32> to vector<128xf32>
    %32 = vector.shape_cast %31 : vector<128xf32> to vector<128x1xf32>
    %33 = vector.broadcast %32 : vector<128x1xf32> to vector<128x128xf32>
    %34 = arith.subf %26, %33 : vector<128x128xf32>
    %35 = math.exp %34 : vector<128x128xf32>
    %cst_14 = arith.constant 1.000000e+00 : f32
    %36 = vector.broadcast %cst_14 : f32 to vector<128x128xf32>
    %cst_15 = arith.constant dense<0.000000e+00> : vector<128x128xf32>
    %37 = tpu.matmul %35, %36, %cst_15 {dimension_numbers = #tpu.dot_dimension_numbers<[1], [0], [0], [1], [0, 0, 1, 1], [], []>} : vector<128x128xf32>, vector<128x128xf32>, vector<128x128xf32> -> vector<128x128xf32>
    %38 = tpu.reciprocal %37 : vector<128x128xf32> -> vector<128x128xf32>
    %39 = arith.mulf %35, %38 : vector<128x128xf32>
    %c0_16 = arith.constant 0 : index
    %c0_17 = arith.constant 0 : index
    %40 = vector.load %arg7[%c0_16, %c0_17] : memref<128x128xf32, #tpu.memory_space<vmem>>, vector<128x128xf32>
    %cst_18 = arith.constant dense<0.000000e+00> : vector<128x128xf32>
    %41 = tpu.matmul %39, %30, %cst_18 {dimension_numbers = #tpu.dot_dimension_numbers<[0], [0], [1], [1], [0, 1, 1, 1], [], []>} : vector<128x128xf32>, vector<128x128xf32>, vector<128x128xf32> -> vector<128x128xf32>
    %42 = arith.addf %40, %41 : vector<128x128xf32>
    %c0_19 = arith.constant 0 : index
    %c0_20 = arith.constant 0 : index
    %43 = vector.load %arg7[%c0_19, %c0_20] : memref<128x128xf32, #tpu.memory_space<vmem>>, vector<128x128xf32>
    tpu.vector_store %arg7[%c0_19, %c0_20], %42 {strides = array<i32>} : memref<128x128xf32, #tpu.memory_space<vmem>>, vector<128x128xf32>,
    %cst_21 = arith.constant dense<0xFF800000> : vector<128xf32>
    %44 = vector.multi_reduction <maximumf>, %22, %cst_21 [0] : vector<128x128xf32> to vector<128xf32>
    %45 = vector.shape_cast %44 : vector<128xf32> to vector<1x128xf32>
    %c0_22 = arith.constant 0 : index
    %c0_23 = arith.constant 0 : index
    %46 = vector.load %arg8[%c0_22, %c0_23] : memref<1x128xf32, #tpu.memory_space<vmem>>, vector<1x128xf32>
    %47 = arith.maximumf %46, %45 : vector<1x128xf32>
    %c0_24 = arith.constant 0 : index
    %c0_25 = arith.constant 0 : index
    %48 = vector.load %arg9[%c0_24, %c0_25] : memref<1x128xf32, #tpu.memory_space<vmem>>, vector<1x128xf32>
    %c0_26 = arith.constant 0 : index
    %c0_27 = arith.constant 0 : index
    %49 = vector.load %arg8[%c0_26, %c0_27] : memref<1x128xf32, #tpu.memory_space<vmem>>, vector<1x128xf32>
    %50 = arith.subf %49, %47 : vector<1x128xf32>
    %51 = math.exp %50 : vector<1x128xf32>
    %52 = arith.mulf %48, %51 : vector<1x128xf32>
    %53 = vector.broadcast %47 : vector<1x128xf32> to vector<128x128xf32>
    %54 = arith.subf %22, %53 : vector<128x128xf32>
    %55 = math.exp %54 : vector<128x128xf32>
    %cst_28 = arith.constant dense<0.000000e+00> : vector<128xf32>
    %56 = vector.multi_reduction <add>, %55, %cst_28 [0] : vector<128x128xf32> to vector<128xf32>
    %57 = vector.shape_cast %56 : vector<128xf32> to vector<1x128xf32>
    %58 = arith.addf %52, %57 : vector<1x128xf32>
    %c0_29 = arith.constant 0 : index
    %c0_30 = arith.constant 0 : index
    %59 = vector.load %arg9[%c0_29, %c0_30] : memref<1x128xf32, #tpu.memory_space<vmem>>, vector<1x128xf32>
    tpu.vector_store %arg9[%c0_29, %c0_30], %58 {strides = array<i32>} : memref<1x128xf32, #tpu.memory_space<vmem>>, vector<1x128xf32>,
    %c0_31 = arith.constant 0 : index
    %c0_32 = arith.constant 0 : index
    %60 = vector.load %arg8[%c0_31, %c0_32] : memref<1x128xf32, #tpu.memory_space<vmem>>, vector<1x128xf32>
    tpu.vector_store %arg8[%c0_31, %c0_32], %47 {strides = array<i32>} : memref<1x128xf32, #tpu.memory_space<vmem>>, vector<1x128xf32>,
    %c2_i32 = arith.constant 2 : i32
    %61 = arith.cmpi eq, %arg1, %c2_i32 : i32
    %62 = arith.extui %61 : i1 to i32
    %c0_i32_33 = arith.constant 0 : i32
    %63 = arith.cmpi ne, %62, %c0_i32_33 : i32
    scf.if %63 {
      %c0_34 = arith.constant 0 : index
      %c0_35 = arith.constant 0 : index
      %64 = vector.load %arg7[%c0_34, %c0_35] : memref<128x128xf32, #tpu.memory_space<vmem>>, vector<128x128xf32>
      %c0_36 = arith.constant 0 : index
      %c0_37 = arith.constant 0 : index
      %c0_38 = arith.constant 0 : index
      %65 = vector.load %arg5[%c0_36, %c0_37, %c0_38] : memref<1x128x128xf32, #tpu.memory_space<vmem>>, vector<1x128x128xf32>
      %66 = vector.shape_cast %65 : vector<1x128x128xf32> to vector<128x128xf32>
      %67 = vector.shape_cast %64 : vector<128x128xf32> to vector<1x128x128xf32>
      tpu.vector_store %arg5[%c0_36, %c0_37, %c0_38], %67 {strides = array<i32>} : memref<1x128x128xf32, #tpu.memory_space<vmem>>, vector<1x128x128xf32>,
      %c0_39 = arith.constant 0 : index
      %c0_40 = arith.constant 0 : index
      %68 = vector.load %arg8[%c0_39, %c0_40] : memref<1x128xf32, #tpu.memory_space<vmem>>, vector<1x128xf32>
      %c0_41 = arith.constant 0 : index
      %c0_42 = arith.constant 0 : index
      %69 = vector.load %arg9[%c0_41, %c0_42] : memref<1x128xf32, #tpu.memory_space<vmem>>, vector<1x128xf32>
      %70 = math.log %69 : vector<1x128xf32>
      %71 = arith.addf %68, %70 : vector<1x128xf32>
      %c0_43 = arith.constant 0 : index
      %c0_44 = arith.constant 0 : index
      %c0_45 = arith.constant 0 : index
      %72 = vector.load %arg6[%c0_43, %c0_44, %c0_45] : memref<1x1x128xf32, #tpu.memory_space<vmem>>, vector<1x1x128xf32>
      %73 = vector.shape_cast %72 : vector<1x1x128xf32> to vector<1x128xf32>
      %74 = vector.shape_cast %71 : vector<1x128xf32> to vector<1x1x128xf32>
      tpu.vector_store %arg6[%c0_43, %c0_44, %c0_45], %74 {strides = array<i32>} : memref<1x1x128xf32, #tpu.memory_space<vmem>>, vector<1x1x128xf32>,
    } else {
    }
    return
  }
  func.func @transform_0(%arg0: i32, %arg1: i32) -> (i32, i32, i32) {
    %c0_i32 = arith.constant 0 : i32
    %c0_i32_0 = arith.constant 0 : i32
    return %arg0, %arg1, %c0_i32 : i32, i32, i32
  }
  func.func @transform_1(%arg0: i32, %arg1: i32) -> (i32, i32, i32) {
    %c0_i32 = arith.constant 0 : i32
    %c0_i32_0 = arith.constant 0 : i32
    return %arg0, %arg1, %c0_i32 : i32, i32, i32
  }
  func.func @transform_2(%arg0: i32, %arg1: i32) -> (i32, i32, i32) {
    %c0_i32 = arith.constant 0 : i32
    %c0_i32_0 = arith.constant 0 : i32
    return %arg0, %arg1, %c0_i32 : i32, i32, i32
  }
  func.func @transform_3(%arg0: i32, %arg1: i32) -> (i32, i32, i32) {
    %c0_i32 = arith.constant 0 : i32
    %c0_i32_0 = arith.constant 0 : i32
    %c0_i32_1 = arith.constant 0 : i32
    return %arg0, %c0_i32, %c0_i32_0 : i32, i32, i32
  }
  func.func @transform_4(%arg0: i32, %arg1: i32) -> (i32, i32, i32) {
    %c0_i32 = arith.constant 0 : i32
    %c0_i32_0 = arith.constant 0 : i32
    %c0_i32_1 = arith.constant 0 : i32
    return %arg0, %c0_i32, %c0_i32_0 : i32, i32, i32
  }
}

</mosaic_0001>

<bundles_post_ra>
// kernel: tpu_custom_call.1
= control target key start
LH: loop header
LB: loop body
LE: loop exit
PB: predicated region body
PF: predicated region fallthrough
CT: control target
= control target key end

     0   :  { %10 = vsyncpa [#allocation6], 0  ;;  %s3041_s0 = inlined_call_operand.hbm [shape: f32[2,320,128], index: 0, kind: input, shape index: {}]   ;;  %s3042_s1 = inlined_call_operand.hbm [shape: f32[2,320,128], index: 1, kind: input, shape index: {}]   ;;  %s3043_s2 = inlined_call_operand.hbm [shape: f32[2,320,128], index: 2, kind: input, shape index: {}]   ;;  %s3044_s3 = inlined_call_operand.hbm [shape: f32[2,128,128], index: 3, kind: output, shape index: {0}]   ;;  %s3045_s4 = inlined_call_operand.hbm [shape: f32[2,1,128], index: 4, kind: output, shape index: {1}]  }
   0x1   :  { %12 = vsyncpa [#allocation6 + $0x1], 0 }
   0x2   :  { %13 = vsyncpa [#allocation9], 0 }
   0x3   :  { %15 = vsyncpa [#allocation9 + $0x1], 0 }
   0x4   :  { %16 = vsyncpa [#allocation7], 0 }
   0x5   :  { %18 = vsyncpa [#allocation7 + $0x1], 0 }
   0x6   :  { %19 = vsyncpa [#allocation13], 0 }
   0x7   :  { %21 = vsyncpa [#allocation13 + $0x1], 0  ;;  %s2216_s15 = smov 0   ;;  %s2218_s16 = smov 0  }
   0x8   :  { %s2220_s17 = smov 0   ;;  %s2222_s18 = smov 0  }
   0x9   :  { %s2224_s19 = smov 0   ;;  %s2226_s20 = smov 0  }
   0xa   :  { %s2228_s21 = smov 0   ;;  %s2230_s22 = smov 0  }
   0xb   :  { %s2232_s23 = smov 0   ;;  %s2234_s24 = smov 0  }
   0xc   :  { %s2236_s25 = smov 0  }
   0xd LB: > { %3054 = sst [smem:[#allocation18_spill]] %s2133_s15  ;;  %s2270_s26 = sadd.s32 4294967295, %s2173_s25   ;;  %s2173_s25 = sphi %s2236_s25, %s27_s25   ;;  %s2169_s24 = sphi %s2234_s24, %s3084_s24   ;;  %s2165_s23 = sphi %s2232_s23, %s3083_s23   ;;  %s2161_s22 = sphi %s2230_s22, %s3082_s22   ;;  %s2157_s21 = sphi %s2228_s21, %s3081_s21   ;;  %s2153_s20 = sphi %s2226_s20, %s3080_s20   ;;  %s2149_s19 = sphi %s2224_s19, %s3079_s19   ;;  %s2145_s18 = sphi %s2222_s18, %s3078_s18   ;;  %s2141_s17 = sphi %s2220_s17, %s3072_s17   ;;  %s2137_s16 = sphi %s2218_s16, %s3077_s16   ;;  %s2133_s15 = sphi %s2216_s15, %s3076_s15  }
   0xe   : > { %3055 = sst [smem:[#allocation19_spill]] %s2141_s17  ;;  %s1419_s27 = sadd.s32 4294967294, %s2173_s25  }
   0xf   : > { %s36_s28 = sadd.s32 1, %s2165_s23  ;;  %s39_s29 = sadd.s32 1, %s2169_s24 }
  0x10   : > { %p37_p0 = scmp.ge.s32.totalorder %s36_s28, 3  ;;  %s48_s30 = sadd.s32 1, %s2153_s20 }
  0x11   : > { %p55_p1 = scmp.ne.s32.totalorder %s2153_s20, %s2149_s19  ;;  %p56_p2 = scmp.eq.s32.totalorder %s2173_s25, 0 }
  0x12   : > { %s3086_s28 = smov (%p37_p0, %s36_s28), 0  ;;  %s3088_s29 = smov (!%p37_p0, %s39_s29), %s2169_s24 }
  0x13   : > { %3056 = sst [smem:[#allocation20_spill]] %s3086_s28  ;;  %s44_s5 = ssub.s32 %s2165_s23, %s3086_s28 }
  0x14   : > { %p2284_p3 = por %p56_p2, %p55_p1  ;;  %p41_p4 = scmp.ge.s32.totalorder %s3088_s29, 2 }
  0x15   : > { %p61_p5 = scmp.ne.s32.totalorder %s2149_s19, %s2145_s18  ;;  %p62_p6 = scmp.eq.s32.totalorder %s2270_s26, 0 }
  0x16   : > { %s130_s7 = sadd.s32 1, %s2141_s17  ;;  %s3090_s29 = smov (%p41_p4, %s3088_s29), 0 }
  0x17   : > { %3058 = sst [smem:[#allocation21_spill]] %s3090_s29  ;;  %p2293_p7 = por %p62_p6, %p61_p5 }
  0x18   : > { %p140_p8 = scmp.ne.s32.totalorder %s2141_s17, %s2137_s16  ;;  %s43_s9 = ssub.s32 %s2169_s24, %s3090_s29 }
  0x19   : > { %p141_p9 = scmp.eq.s32.totalorder %s2270_s26, 5  ;;  %s45_s10 = sor.u32 %s44_s5, %s43_s9 }
  0x1a   : > { %p128_p10 = scmp.eq.s32.totalorder %s43_s9, 0  ;;  %p46_p11 = scmp.eq.s32.totalorder %s45_s10, 0 }
  0x1b   : > { %p2302_p12 = por %p141_p9, %p140_p8  ;;  %p146_p13 = scmp.ne.s32.totalorder %s2137_s16, %s2133_s15 }
  0x1c   : > { %s2307_s12 = scalar_select %p128_p10, %s2141_s17, %s130_s7  }
  0x1d   : > { %s3060_s11 = scalar_select %p2302_p12, 1, 0 }
  0x1e   : > { %3061 = sst [smem:[#allocation22_spill]] %s2307_s12  ;;  %p147_p0 = scmp.eq.s32.totalorder %s1419_s27, 5 }
  0x1f   : > { %s2310_s13 = scalar_select %p46_p11, %s2153_s20, %s48_s30  }
  0x20   : > { %p2314_p1 = por %p147_p0, %p146_p13  ;;  %p1421_p2 = scmp.ge.s32.totalorder %s2173_s25, 6 }
  0x21   : > { %3062 = sst [smem:[#allocation23_spill]] %s2310_s13 }
  0x22   : > { %s3063_s14 = scalar_select %p2314_p1, 1, 0 }
  0x23   : > { %189 = sbr.rel (%p1421_p2) target bundleno = 153 (0x99), region = 16 }
  0x24   : > { %3064 = sst [smem:[#allocation24_spill]] %s3063_s14 }
  0x2a   : > { %192 = sbr.rel (!%p2284_p3) target bundleno = 79 (0x4f), region = 20  ;;  %s193_s18 = sand.u32 (%p2284_p3), 1, %s2153_s20  }
  0x2b   : > { %s1423_s5 = sshll.u32 (%p2284_p3), %s2165_s23, 4  ;;  %s1422_s7 = sshll.u32 (%p2284_p3), %s193_s18, 7 }
  0x2c   : > { %s199_s9 = ssub.s32 (%p2284_p3), 40, %s1423_s5  ;;  %s2326_s10 = scalar_lea.sflag (%p2284_p3), [#allocation6], %s193_s18 }
  0x2d   : > { %p200_p4 = scmp.lt.s32.totalorder (%p2284_p3), %s199_s9, 16  ;;  %s197_s29 = scalar_lea.vmem (%p2284_p3), [#allocation5], %s1422_s7 }
  0x31   : > { %s3092_s9 = smov (!%p200_p4, %s199_s9), 16 }
  0x32   : > { %s2323_s30 = sshll.u32 %s3092_s9, 7 }
  0x33   : > { %s204_s27 = ssub.s32 2048, %s2323_s30 }
  0x34   : > { %205 = vsyncadd %s2326_s10, %s204_s27  ;;  %p1425_p5 = scmp.ne.s32.totalorder %s2323_s30, 0  ;;  %s1714_s28 = smul.u32 40, %s2169_s24 }
  0x35   : > { %s212_s13 = sshll.u32 %s197_s29, 4  ;;  %s2331_s13 = int_to_ptr.vmem [resolvable:$true] %s212_s13 }
  0x36   : > { %s208_s12 = sadd.s32 %s1714_s28, %s1423_s5  ;;  %s1935_s28 = scalar_lea.hbm %s3041_s0, 10240 }
  0x37   : > { %s1426_s17 = sshll.u32 %s208_s12, 7 }
  0x38   : > { %s2336_s15 = scalar_lea.hbm %s3041_s0, %s1426_s17 }
  0x39   : > { %s1931_s18 = scalar_lea.hbm %s2336_s15, %s2323_s30  ;;  %p1936_p10 = scmp.lt.u32.totalorder %s2336_s15, %s3041_s0 }
  0x3a   : > { %p1932_p6 = scmp.ne.s32.totalorder %s2336_s15, %s1931_s18  ;;  %p1937_p11 = scmp.lt.u32.totalorder %s1935_s28, %s1931_s18 }
  0x3b   : > { %p1939_p0 = scmp.lt.u32.totalorder %s1931_s18, %s2336_s15 }
  0x3c   : > { %p1933_p8 = pnand %p1932_p6, %p1425_p5  ;;  %p1938_p13 = por %p1937_p11, %p1936_p10 }
  0x3e   : > { %p1934_p9 = pneg %p1933_p8  ;;  %p1940_p2 = por %p1939_p0, %p1938_p13 }
  0x40   : > { %p1941_p4 = pnand %p1940_p2, %p1934_p9 }
  0x42   : > { %1944 = shalt.err (!%p1941_p4)
}
  0x43   : > { %s1945_s17 = scalar_lea.vmem %s2331_s13, %s2323_s30  ;;  %s2175_s14 = smov [#allocation5]  }
  0x44   : > { %p1946_p6 = scmp.ne.s32.totalorder %s2331_s13, %s1945_s17  ;;  %s1949_s27 = sshll.u32 %s2175_s14, 4  ;;  %s1950_s27 = int_to_ptr.vmem [resolvable:$false] %s1949_s27 }
  0x45   : > { %s1951_s9 = scalar_lea.vmem %s1950_s27, 4096  ;;  %p1952_p12 = scmp.lt.s32.totalorder %s2331_s13, %s1950_s27 }
  0x46   : > { %p1947_p8 = pnand %p1946_p6, %p1425_p5  ;;  %p1953_p10 = scmp.lt.s32.totalorder %s1951_s9, %s1945_s17 }
  0x48   : > { %p1948_p1 = pneg %p1947_p8  ;;  %p1954_p11 = por %p1953_p10, %p1952_p12 }
  0x4a   : > { %p1955_p13 = pnand %p1954_p11, %p1948_p1 }
  0x4c   : > { %1958 = shalt.err (!%p1955_p13)
}
  0x4d   : > { %s2176_s18 = smov 128   ;;  %s2177_s7 = smov 8  }
  0x4e   : > { %218 = dma.hbm_to_vmem [thread:$0]  (%p1425_p5), %s2336_s15, %s2323_s30, %s2331_s13, %s2326_s10, %s2176_s18, %s2176_s18, %s2177_s7  }
  0x4f PF: > { %221 = sbr.rel (!%p2284_p3) target bundleno = 116 (0x74), region = 24  ;;  %s222_s29 = sand.u32 (%p2284_p3), 1, %s2173_s25  }
  0x50   : > { %s224_s28 = sand.u32 (%p2284_p3), 1, %s2153_s20   ;;  %s1430_s12 = sshll.u32 (%p2284_p3), %s2165_s23, 4 }
  0x51   : > { %s1429_s5 = sshll.u32 (%p2284_p3), %s224_s28, 7  ;;  %s228_s17 = ssub.s32 (%p2284_p3), 40, %s1430_s12 }
  0x52   : > { %p229_p12 = scmp.lt.s32.totalorder (%p2284_p3), %s228_s17, 16  ;;  %s2371_s9 = scalar_lea.sflag (%p2284_p3), [#allocation9], %s222_s29 }
  0x53   : > { %s226_s15 = scalar_lea.vmem (%p2284_p3), [#allocation8], %s1429_s5 }
  0x56   : > { %s3094_s17 = smov (!%p229_p12, %s228_s17), 16 }
  0x57   : > { %s2368_s14 = sshll.u32 %s3094_s17, 7 }
  0x58   : > { %s233_s27 = ssub.s32 2048, %s2368_s14 }
  0x59   : > { %234 = vsyncadd %s2371_s9, %s233_s27  ;;  %p1432_p1 = scmp.ne.s32.totalorder %s2368_s14, 0  ;;  %s1715_s13 = smul.u32 40, %s2169_s24 }
  0x5a   : > { %s241_s30 = sshll.u32 %s226_s15, 4  ;;  %s2376_s30 = int_to_ptr.vmem [resolvable:$true] %s241_s30 }
  0x5b   : > { %s237_s10 = sadd.s32 %s1715_s13, %s1430_s12  ;;  %s1963_s12 = scalar_lea.hbm %s3042_s1, 10240 }
  0x5c   : > { %s1433_s18 = sshll.u32 %s237_s10, 7 }
  0x5d   : > { %s2381_s17 = scalar_lea.hbm %s3042_s1, %s1433_s18 }
  0x5e   : > { %s1959_s29 = scalar_lea.hbm %s2381_s17, %s2368_s14  ;;  %p1964_p2 = scmp.lt.u32.totalorder %s2381_s17, %s3042_s1 }
  0x5f   : > { %p1960_p5 = scmp.ne.s32.totalorder %s2381_s17, %s1959_s29  ;;  %p1965_p4 = scmp.lt.u32.totalorder %s1963_s12, %s1959_s29 }
  0x60   : > { %p1967_p8 = scmp.lt.u32.totalorder %s1959_s29, %s2381_s17 }
  0x61   : > { %p1961_p9 = pnand %p1960_p5, %p1432_p1  ;;  %p1966_p6 = por %p1965_p4, %p1964_p2 }
  0x63   : > { %p1962_p0 = pneg %p1961_p9  ;;  %p1968_p10 = por %p1967_p8, %p1966_p6 }
  0x65   : > { %p1969_p11 = pnand %p1968_p10, %p1962_p0 }
  0x67   : > { %1972 = shalt.err (!%p1969_p11)
}
  0x68   : > { %s1973_s10 = scalar_lea.vmem %s2376_s30, %s2368_s14  ;;  %s2178_s18 = smov [#allocation8]  }
  0x69   : > { %p1974_p13 = scmp.ne.s32.totalorder %s2376_s30, %s1973_s10  ;;  %s1977_s7 = sshll.u32 %s2178_s18, 4  ;;  %s1978_s7 = int_to_ptr.vmem [resolvable:$false] %s1977_s7 }
  0x6a   : > { %s1979_s28 = scalar_lea.vmem %s1978_s7, 4096  ;;  %p1980_p9 = scmp.lt.s32.totalorder %s2376_s30, %s1978_s7 }
  0x6b   : > { %p1975_p12 = pnand %p1974_p13, %p1432_p1  ;;  %p1981_p2 = scmp.lt.s32.totalorder %s1979_s28, %s1973_s10 }
  0x6d   : > { %p1976_p5 = pneg %p1975_p12  ;;  %p1982_p4 = por %p1981_p2, %p1980_p9 }
  0x6f   : > { %p1983_p6 = pnand %p1982_p4, %p1976_p5 }
  0x71   : > { %1986 = shalt.err (!%p1983_p6)
}
  0x72   : > { %s2179_s29 = smov 128   ;;  %s2180_s5 = smov 8  }
  0x73   : > { %247 = dma.hbm_to_vmem [thread:$0]  (%p1432_p1), %s2381_s17, %s2368_s14, %s2376_s30, %s2371_s9, %s2179_s29, %s2179_s29, %s2180_s5  }
  0x74 PF: > { %250 = sbr.rel (!%p2284_p3) target bundleno = 153 (0x99), region = 28  ;;  %s251_s27 = sand.u32 (%p2284_p3), 1, %s2173_s25  }
  0x75   : > { %s253_s12 = sand.u32 (%p2284_p3), 1, %s2153_s20   ;;  %s1437_s13 = sshll.u32 (%p2284_p3), %s2165_s23, 4 }
  0x76   : > { %s1436_s15 = sshll.u32 (%p2284_p3), %s253_s12, 7  ;;  %s257_s10 = ssub.s32 (%p2284_p3), 40, %s1437_s13 }
  0x77   : > { %p258_p0 = scmp.lt.s32.totalorder (%p2284_p3), %s257_s10, 16  ;;  %s2416_s28 = scalar_lea.sflag (%p2284_p3), [#allocation9], %s251_s27 }
  0x78   : > { %s255_s14 = scalar_lea.vmem (%p2284_p3), [#allocation10], %s1436_s15 }
  0x7b   : > { %s3096_s10 = smov (!%p258_p0, %s257_s10), 16 }
  0x7c   : > { %s2413_s18 = sshll.u32 %s3096_s10, 7 }
  0x7d   : > { %s262_s7 = ssub.s32 2048, %s2413_s18 }
  0x7e   : > { %263 = vsyncadd %s2416_s28, %s262_s7  ;;  %p1439_p3 = scmp.ne.s32.totalorder %s2413_s18, 0  ;;  %s1716_s6 = smul.u32 40, %s2169_s24 }
  0x7f   : > { %s270_s9 = sshll.u32 %s255_s14, 4  ;;  %s2421_s9 = int_to_ptr.vmem [resolvable:$true] %s270_s9 }
  0x80   : > { %s266_s30 = sadd.s32 %s1716_s6, %s1437_s13  ;;  %s1991_s13 = scalar_lea.hbm %s3043_s2, 10240 }
  0x81   : > { %s1440_s17 = sshll.u32 %s266_s30, 7 }
  0x82   : > { %s2426_s12 = scalar_lea.hbm %s3043_s2, %s1440_s17 }
  0x83   : > { %s1987_s27 = scalar_lea.hbm %s2426_s12, %s2413_s18  ;;  %p1992_p11 = scmp.lt.u32.totalorder %s2426_s12, %s3043_s2 }
  0x84   : > { %p1988_p1 = scmp.ne.s32.totalorder %s2426_s12, %s1987_s27  ;;  %p1993_p13 = scmp.lt.u32.totalorder %s1991_s13, %s1987_s27 }
  0x85   : > { %p1995_p5 = scmp.lt.u32.totalorder %s1987_s27, %s2426_s12 }
  0x86   : > { %p1989_p8 = pnand %p1988_p1, %p1439_p3  ;;  %p1994_p12 = por %p1993_p13, %p1992_p11 }
  0x88   : > { %p1990_p10 = pneg %p1989_p8  ;;  %p1996_p9 = por %p1995_p5, %p1994_p12 }
  0x8a   : > { %p1997_p2 = pnand %p1996_p9, %p1990_p10 }
  0x8c   : > { %2000 = shalt.err (!%p1997_p2)
}
  0x8d   : > { %s2001_s6 = scalar_lea.vmem %s2421_s9, %s2413_s18  ;;  %s2181_s30 = smov [#allocation10]  }
  0x8e   : > { %p2002_p4 = scmp.ne.s32.totalorder %s2421_s9, %s2001_s6  ;;  %s2005_s17 = sshll.u32 %s2181_s30, 4  ;;  %s2006_s17 = int_to_ptr.vmem [resolvable:$false] %s2005_s17 }
  0x8f   : > { %s2007_s29 = scalar_lea.vmem %s2006_s17, 4096  ;;  %p2008_p1 = scmp.lt.s32.totalorder %s2421_s9, %s2006_s17 }
  0x90   : > { %p2003_p6 = pnand %p2002_p4, %p1439_p3  ;;  %p2009_p8 = scmp.lt.s32.totalorder %s2007_s29, %s2001_s6 }
  0x92   : > { %p2004_p0 = pneg %p2003_p6  ;;  %p2010_p11 = por %p2009_p8, %p2008_p1 }
  0x94   : > { %p2011_p13 = pnand %p2010_p11, %p2004_p0 }
  0x96   : > { %2014 = shalt.err (!%p2011_p13)
}
  0x97   : > { %s2182_s5 = smov 128   ;;  %s2183_s27 = smov 8  }
  0x98   : > { %276 = dma.hbm_to_vmem [thread:$0]  (%p1439_p3), %s2426_s12, %s2413_s18, %s2421_s9, %s2416_s28, %s2182_s5, %s2182_s5, %s2183_s27  }
  0x99 PF: > { %p1443_p10 = scmp.ge.s32.totalorder %s2173_s25, 1  ;;  %p278_p12 = scmp.lt.s32.totalorder %s2173_s25, 7 }
  0x9b   : > { %p279_p5 = pnand %p1443_p10, %p278_p12 }
  0x9c   : > { %s284_s15 = sand.u32 (!%p279_p5), 1, %s2149_s19  }
  0x9d   : > { %282 = sbr.rel (%p279_p5) target bundleno = 1039 (0x40f), region = 32  ;;  %s1444_s10 = sshll.u32 (!%p279_p5), %s284_s15, 7 }
  0x9e   : > { %s285_s13 = scalar_lea.sflag (!%p279_p5), [#allocation6], %s284_s15  ;;  %s2456_s7 = scalar_lea.vmem (!%p279_p5), [#allocation5], %s1444_s10 }
  0xa4   : > { %2116 = dma.done.wait (%p2293_p7), %s285_s13, 2048  }
  0xa5   : > { %2118 = vsyncadd (%p2293_p7), %s285_s13, 4294965248  ;;  %s293_s18 = sand.u32 1, %s2270_s26   ;;  %s2463_s9 = scalar_lea.vmem [#allocation8], %s1444_s10 }
  0xa6   : > { %s294_s28 = scalar_lea.sflag [#allocation9], %s293_s18 }
  0xa7   : > { %2120 = dma.done.wait (%p2293_p7), %s294_s28, 4096  }
  0xa8   : > { %2122 = vsyncadd (%p2293_p7), %s294_s28, 4294963200  ;;  %s2470_s12 = sand.u32 1, %s2137_s16   ;;  %s2473_s6 = scalar_lea.vmem [#allocation10], %s1444_s10 }
  0xa9   : > { %s1447_s14 = sshll.u32 %s2470_s12, 7  ;;  %s344_s17 = scalar_lea.vmem [#allocation12], %s2470_s12 }
  0xaa   : > { %s2475_s30 = scalar_lea.vmem [#allocation11], %s1447_s14  ;;  %p1448_p3 = scmp.ne.s32.totalorder %s2157_s21, 0 }
  0xab   : > { %v2184_v0 = vmov (!%p1448_p3), 0.0   ;;  %v2185_v1 = vmov (!%p1448_p3), -inf  }
  0xac   : > { %363 = sbr.rel (%p1448_p3) target bundleno = 181 (0xb5), region = 48  ;;  %364 = vst [vmem:[#allocation2] sm:$0xff] (!%p1448_p3), %v2184_v0  ;;  %365 = vst [vmem:[#allocation2 + $0x8] sm:$0xff] (!%p1448_p3), %v2184_v0 }
  0xad   : > { %366 = vst [vmem:[#allocation2 + $0x10] sm:$0xff] (!%p1448_p3), %v2184_v0  ;;  %367 = vst [vmem:[#allocation2 + $0x18] sm:$0xff] (!%p1448_p3), %v2184_v0 }
  0xae   : > { %368 = vst [vmem:[#allocation2 + $0x20] sm:$0xff] (!%p1448_p3), %v2184_v0  ;;  %369 = vst [vmem:[#allocation2 + $0x28] sm:$0xff] (!%p1448_p3), %v2184_v0 }
  0xaf   : > { %370 = vst [vmem:[#allocation2 + $0x30] sm:$0xff] (!%p1448_p3), %v2184_v0  ;;  %371 = vst [vmem:[#allocation2 + $0x38] sm:$0xff] (!%p1448_p3), %v2184_v0 }
  0xb0   : > { %372 = vst [vmem:[#allocation2 + $0x40] sm:$0xff] (!%p1448_p3), %v2184_v0  ;;  %373 = vst [vmem:[#allocation2 + $0x48] sm:$0xff] (!%p1448_p3), %v2184_v0 }
  0xb1   : > { %374 = vst [vmem:[#allocation2 + $0x50] sm:$0xff] (!%p1448_p3), %v2184_v0  ;;  %375 = vst [vmem:[#allocation2 + $0x58] sm:$0xff] (!%p1448_p3), %v2184_v0 }
  0xb2   : > { %376 = vst [vmem:[#allocation2 + $0x60] sm:$0xff] (!%p1448_p3), %v2184_v0  ;;  %377 = vst [vmem:[#allocation2 + $0x68] sm:$0xff] (!%p1448_p3), %v2184_v0 }
  0xb3   : > { %378 = vst [vmem:[#allocation2 + $0x70] sm:$0xff] %v2184_v0  ;;  %379 = vst [vmem:[#allocation2 + $0x78] sm:$0xff] %v2184_v0 }
  0xb4   : > { %381 = vst [vmem:[#allocation4] sm:$0x1] %v2184_v0  ;;  %380 = vst [vmem:[#allocation3] sm:$0x1] %v2185_v1 }
  0xb5 PF: > { %v414_v2 = vld [vmem:[%s2463_s9] sm:$0xff]  ;;  %v462_v3 = vlaneseq  ;;  %s1449_s26 = sshll.u32 %s2157_s21, 7  ;;  %v416_v5 = vld [vmem:[%s2463_s9 + $0x10] sm:$0xff]  ;;  %v2186_v9 = vmov 1.0|1.0   ;;  %v415_v13 = vld [vmem:[%s2463_s9 + $0x8] sm:$0xff] }
  0xb6   : > { %v382_v4 = vld [vmem:[%s2456_s7] sm:$0xff]  ;;  %v430_v6 = vmul.f32 0.088388346, %v414_v2  ;;  %v2483_v7 = vstv %s1449_s26  ;;  %1650 = vmatprep.subr.bf16.mxu0 %v2186_v9  ;;  %v432_v11 = vmul.f32 0.088388346, %v416_v5  ;;  %v384_v12 = vld [vmem:[%s2456_s7 + $0x10] sm:$0xff] }
  0xb7   : > { %v398_v8 = vmul.f32 0.088388346, %v382_v4  ;;  %v2486_v10 = vshrl.u32 %v462_v3, 7  ;;  %v383_v14 = vld [vmem:[%s2456_s7 + $0x8] sm:$0xff]  ;;  %1651 = vmatpush3.bf16.msra.mxu0 %v2186_v9  ;;  %v400_v15 = vmul.f32 0.088388346, %v384_v12 }
  0xb8   : > { %v431_v16 = vmul.f32 0.088388346, %v415_v13  ;;  %v399_v17 = vmul.f32 0.088388346, %v383_v14  ;;  %1652 = vmatprep.subr.bf16.mxu0 %v2186_v9  ;;  %v417_v21 = vld [vmem:[%s2463_s9 + $0x18] sm:$0xff]  ;;  %v418_v24 = vld [vmem:[%s2463_s9 + $0x20] sm:$0xff] }
  0xb9   : > { %v2495_v18 = vadd.s32 %v2483_v7, %v2486_v10  ;;  %v465_v19 = vadd.s32 16, %v2486_v10  ;;  %v464_v20 = vadd.s32 8, %v2486_v10  ;;  %v466_v22 = vadd.s32 24, %v2486_v10  ;;  %v385_v23 = vld [vmem:[%s2456_s7 + $0x18] sm:$0xff]  ;;  %v386_v31 = vld [vmem:[%s2456_s7 + $0x20] sm:$0xff]  ;;  %v419_v32 = vld [vmem:[%s2463_s9 + $0x28] sm:$0xff] }
  0xba   : > { %v433_v25 = vmul.f32 0.088388346, %v417_v21  ;;  %v401_v26 = vmul.f32 0.088388346, %v385_v23  ;;  %v434_v27 = vmul.f32 0.088388346, %v418_v24 }
  0xbb   : > { %vm497_vm0 = vcmp.lt.s32.totalorder %v2495_v18, 320  ;;  %v2505_v28 = vadd.s32 %v2483_v7, %v465_v19  ;;  %v2508_v29 = vadd.s32 %v2483_v7, %v464_v20  ;;  %v2511_v30 = vadd.s32 %v2483_v7, %v466_v22  ;;  %v387_v33 = vld [vmem:[%s2456_s7 + $0x28] sm:$0xff]  ;;  %1653 = vmatpush3.bf16.msra.mxu0 %v2186_v9  ;;  %v420_v39 = vld [vmem:[%s2463_s9 + $0x30] sm:$0xff]  ;;  %v421_v49 = vld [vmem:[%s2463_s9 + $0x38] sm:$0xff]  ;;  %p1466_p7 = scmp.ne.s32.totalorder %s2157_s21, 2 }
  0xbc   : > { %v2519_v34 = vsel %vm497_vm0, %v430_v6, 0.0  ;;  %v2523_v35 = vsel %vm497_vm0, %v398_v8, -1e+30  ;;  %v467_v36 = vadd.s32 32, %v2486_v10  ;;  %v402_v37 = vmul.f32 0.088388346, %v386_v31  ;;  %1654 = vmatprep.subr.bf16.mxu0 %v2186_v9 }
  0xbd   : > { %593 = vmax.xlane.f32.xlu0 %v2519_v34  ;;  %vm499_vm1 = vcmp.lt.s32.totalorder %v2505_v28, 320  ;;  %vm498_vm2 = vcmp.lt.s32.totalorder %v2508_v29, 320  ;;  %vm500_vm3 = vcmp.lt.s32.totalorder %v2511_v30, 320  ;;  %v435_v38 = vmul.f32 0.088388346, %v419_v32  ;;  %v388_v48 = vld [vmem:[%s2456_s7 + $0x30] sm:$0xff] }
  0xbe   : > { %v2534_v40 = vsel %vm499_vm1, %v432_v11, 0.0  ;;  %v2538_v41 = vsel %vm499_vm1, %v400_v15, -1e+30  ;;  %v2542_v42 = vsel %vm498_vm2, %v431_v16, 0.0  ;;  %v2546_v43 = vsel %vm498_vm2, %v399_v17, -1e+30 }
  0xbf   : > { %597 = vmax.xlane.f32.xlu1 %v2534_v40  ;;  %v2551_v44 = vsel %vm500_vm3, %v433_v25, 0.0  ;;  %v2555_v45 = vsel %vm500_vm3, %v401_v26, -1e+30  ;;  %v2558_v46 = vadd.s32 %v2483_v7, %v467_v36  ;;  %v468_v47 = vadd.s32 40, %v2486_v10  ;;  %1655 = vmatpush3.bf16.msra.mxu0 %v2186_v9  ;;  %v389_v57 = vld [vmem:[%s2456_s7 + $0x38] sm:$0xff]  ;;  %v422_v62 = vld [vmem:[%s2463_s9 + $0x40] sm:$0xff] }
  0xc0   : > { %v403_v50 = vmul.f32 0.088388346, %v387_v33  ;;  %v436_v51 = vmul.f32 0.088388346, %v420_v39  ;;  %v469_v52 = vadd.s32 48, %v2486_v10  ;;  %v470_v53 = vadd.s32 56, %v2486_v10  ;;  %1656 = vmatprep.subr.bf16.mxu0 %v2186_v9 }
  0xc1   : > { %595 = vmax.xlane.f32.xlu0 %v2542_v42  ;;  %vm501_vm4 = vcmp.lt.s32.totalorder %v2558_v46, 320  ;;  %v2570_v54 = vadd.s32 %v2483_v7, %v468_v47  ;;  %v404_v55 = vmul.f32 0.088388346, %v388_v48  ;;  %v437_v56 = vmul.f32 0.088388346, %v421_v49  ;;  %v390_v1 = vld [vmem:[%s2456_s7 + $0x40] sm:$0xff] }
  0xc2   : > { %v2575_v58 = vsel %vm501_vm4, %v434_v27, 0.0  ;;  %v2579_v59 = vsel %vm501_vm4, %v402_v37, -1e+30  ;;  %v2582_v60 = vadd.s32 %v2483_v7, %v469_v52  ;;  %v2585_v61 = vadd.s32 %v2483_v7, %v470_v53  ;;  %v423_v4 = vld [vmem:[%s2463_s9 + $0x48] sm:$0xff]  ;;  %v424_v12 = vld [vmem:[%s2463_s9 + $0x50] sm:$0xff]  ;;  %v425_v19 = vld [vmem:[%s2463_s9 + $0x58] sm:$0xff] }
  0xc3   : > { %599 = vmax.xlane.f32.xlu1 %v2551_v44  ;;  %vm502_vm5 = vcmp.lt.s32.totalorder %v2570_v54, 320  ;;  %v405_v63 = vmul.f32 0.088388346, %v389_v57  ;;  %v438_v0 = vmul.f32 0.088388346, %v422_v62  ;;  %1657 = vmatpush3.bf16.msra.mxu0 %v2186_v9  ;;  %v1075_v5 = vmax.f32 %v2523_v35, %v2579_v59  ;;  %v391_v11 = vld [vmem:[%s2456_s7 + $0x48] sm:$0xff] }
  0xc4   : > { %v2594_v2 = vsel %vm502_vm5, %v435_v38, 0.0  ;;  %v2598_v3 = vsel %vm502_vm5, %v403_v50, -1e+30  ;;  %vm503_vm6 = vcmp.lt.s32.totalorder %v2582_v60, 320  ;;  %vm504_vm7 = vcmp.lt.s32.totalorder %v2585_v61, 320  ;;  %1658 = vmatprep.subr.bf16.mxu0 %v2186_v9  ;;  %v392_v17 = vld [vmem:[%s2456_s7 + $0x50] sm:$0xff] }
  0xc5   : > { %601 = vmax.xlane.f32.xlu0 %v2575_v58  ;;  %v2609_v6 = vsel %vm503_vm6, %v436_v51, 0.0  ;;  %v2613_v8 = vsel %vm503_vm6, %v404_v55, -1e+30  ;;  %v1076_v13 = vmax.f32 %v2546_v43, %v2598_v3  ;;  %v2621_v14 = vsel %vm504_vm7, %v437_v56, 0.0  ;;  %v393_v24 = vld [vmem:[%s2456_s7 + $0x58] sm:$0xff]  ;;  %v426_v47 = vld [vmem:[%s2463_s9 + $0x60] sm:$0xff] }
  0xc6   : > { %v2625_v15 = vsel %vm504_vm7, %v405_v63, -1e+30  ;;  %v471_v16 = vadd.s32 64, %v2486_v10  ;;  %v1077_v20 = vmax.f32 %v2538_v41, %v2613_v8  ;;  %v406_v21 = vmul.f32 0.088388346, %v390_v1  ;;  %v394_v56 = vld [vmem:[%s2456_s7 + $0x60] sm:$0xff] }
  0xc7   : > { %603 = vmax.xlane.f32.xlu1 %v2594_v2  ;;  %v439_v22 = vmul.f32 0.088388346, %v423_v4  ;;  %v472_v23 = vadd.s32 72, %v2486_v10  ;;  %1659 = vmatpush3.bf16.msra.mxu0 %v2186_v9  ;;  %v407_v26 = vmul.f32 0.088388346, %v391_v11  ;;  %v473_v31 = vadd.s32 80, %v2486_v10 }
  0xc8   : > { %v2637_v25 = vadd.s32 %v2483_v7, %v471_v16  ;;  %v440_v27 = vmul.f32 0.088388346, %v424_v12  ;;  %1660 = vmatprep.subr.bf16.mxu0 %v2186_v9  ;;  %v408_v33 = vmul.f32 0.088388346, %v392_v17  ;;  %v441_v36 = vmul.f32 0.088388346, %v425_v19 }
  0xc9   : > { %605 = vmax.xlane.f32.xlu0 %v2609_v6  ;;  %v2643_v32 = vadd.s32 %v2483_v7, %v472_v23  ;;  %v474_v37 = vadd.s32 88, %v2486_v10  ;;  %v2648_v38 = vadd.s32 %v2483_v7, %v473_v31  ;;  %v409_v39 = vmul.f32 0.088388346, %v393_v24  ;;  %v427_v57 = vld [vmem:[%s2463_s9 + $0x68] sm:$0xff]  ;;  %v428_v16 = vld [vmem:[%s2463_s9 + $0x70] sm:$0xff]  ;;  %v429_v23 = vld [vmem:[%s2463_s9 + $0x78] sm:$0xff] }
  0xca   : > { %vm505_vm8 = vcmp.lt.s32.totalorder %v2637_v25, 320  ;;  %v475_v48 = vadd.s32 96, %v2486_v10  ;;  %v1078_v52 = vmax.f32 %v2555_v45, %v2625_v15  ;;  %v395_v1 = vld [vmem:[%s2456_s7 + $0x68] sm:$0xff]  ;;  %v396_v17 = vld [vmem:[%s2456_s7 + $0x70] sm:$0xff]  ;;  %v397_v24 = vld [vmem:[%s2456_s7 + $0x78] sm:$0xff]  ;;  %v477_v31 = vadd.s32 112, %v2486_v10 }
  0xcb   : > { %607 = vmax.xlane.f32.xlu1 %v2621_v14  ;;  %v2655_v49 = vsel %vm505_vm8, %v438_v0, 0.0  ;;  %v2659_v50 = vsel %vm505_vm8, %v406_v21, -1e+30  ;;  %vm506_vm9 = vcmp.lt.s32.totalorder %v2643_v32, 320  ;;  %v2663_v51 = vadd.s32 %v2483_v7, %v474_v37  ;;  %1661 = vmatpush3.bf16.msra.mxu0 %v2186_v9  ;;  %v452_v29 = vld [vmem:[%s2473_s6 + $0x30] sm:$0xff]  ;;  %v454_v30 = vld [vmem:[%s2473_s6 + $0x40] sm:$0xff] }
  0xcc   : > { %v2670_v53 = vsel %vm506_vm9, %v439_v22, 0.0  ;;  %v2674_v55 = vsel %vm506_vm9, %v407_v26, -1e+30  ;;  %vm507_vm10 = vcmp.lt.s32.totalorder %v2648_v38, 320  ;;  %1662 = vmatprep.subr.bf16.mxu0 %v2186_v9  ;;  %v1079_v62 = vmax.f32 %v1075_v5, %v2659_v50  ;;  %v456_v54 = vld [vmem:[%s2473_s6 + $0x50] sm:$0xff]  ;;  %v458_v60 = vld [vmem:[%s2473_s6 + $0x60] sm:$0xff] }
  0xcd   : > { %609 = vmax.xlane.f32.xlu0 %v2655_v49  ;;  %v2684_v63 = vsel %vm507_vm10, %v408_v33, -1e+30  ;;  %vm508_vm11 = vcmp.lt.s32.totalorder %v2663_v51, 320  ;;  %v442_v0 = vmul.f32 0.088388346, %v426_v47  ;;  %v1080_v4 = vmax.f32 %v1076_v13, %v2674_v55  ;;  %v459_v61 = vld [vmem:[%s2473_s6 + $0x68] sm:$0xff] }
  0xce   : > { %v2691_v11 = vsel %vm507_vm10, %v440_v27, 0.0  ;;  %v2695_v12 = vsel %vm508_vm11, %v409_v39, -1e+30  ;;  %v2698_v5 = vadd.s32 %v2483_v7, %v475_v48  ;;  %v1081_v19 = vmax.f32 %v1077_v20, %v2684_v63 }
  0xcf   : > { %611 = vmax.xlane.f32.xlu1 %v2670_v53  ;;  %v2706_v13 = vsel %vm508_vm11, %v441_v36, 0.0  ;;  %v410_v21 = vmul.f32 0.088388346, %v394_v56  ;;  %v476_v22 = vadd.s32 104, %v2486_v10  ;;  %1663 = vmatpush3.bf16.msra.mxu0 %v2186_v9  ;;  %v443_v26 = vmul.f32 0.088388346, %v427_v57 }
  0xd0   : > { %vm509_vm12 = vcmp.lt.s32.totalorder %v2698_v5, 320  ;;  %v411_v27 = vmul.f32 0.088388346, %v395_v1  ;;  %1664 = vmatprep.subr.bf16.mxu0 %v2186_v9  ;;  %v1082_v20 = vmax.f32 %v1078_v52, %v2695_v12  ;;  %v412_v37 = vmul.f32 0.088388346, %v396_v17 }
  0xd1   : > { %613 = vmax.xlane.f32.xlu0 %v2691_v11  ;;  %v2719_v33 = vsel %vm509_vm12, %v410_v21, -1e+30  ;;  %v2722_v36 = vadd.s32 %v2483_v7, %v476_v22  ;;  %v2726_v39 = vsel %vm509_vm12, %v442_v0, 0.0  ;;  %v444_v47 = vmul.f32 0.088388346, %v428_v16 }
  0xd2   : > { %v2729_v48 = vadd.s32 %v2483_v7, %v477_v31  ;;  %v478_v56 = vadd.s32 120, %v2486_v10  ;;  %v1083_v52 = vmax.f32 %v1079_v62, %v2719_v33  ;;  %v445_v57 = vmul.f32 0.088388346, %v429_v23 }
  0xd3   : > { %615 = vmax.xlane.f32.xlu1 %v2706_v13  ;;  %vm510_vm13 = vcmp.lt.s32.totalorder %v2722_v36, 320  ;;  %v413_v1 = vmul.f32 0.088388346, %v397_v24  ;;  %1665 = vmatpush3.bf16.msra.mxu0 %v2186_v9 }
  0xd4   : > { %v2738_v0 = vsel %vm510_vm13, %v443_v26, 0.0  ;;  %v2742_v16 = vsel %vm510_vm13, %v411_v27, -1e+30  ;;  %vm3053_vm14 = vcmp.lt.s32.totalorder %v2729_v48, 320  ;;  %v2746_v17 = vadd.s32 %v2483_v7, %v478_v56 }
  0xd5   : > { %617 = vmax.xlane.f32.xlu0 %v2726_v39  ;;  %v1084_v62 = vmax.f32 %v1080_v4, %v2742_v16  ;;  %v2752_v9 = vsel %vm3053_vm14, %v412_v37, -1e+30  ;;  %v2756_v21 = vsel %vm3053_vm14, %v444_v47, 0.0  ;;  %vm1673_vm14 = vmpackc.low %vm500_vm3, %vm499_vm1 }
  0xd6   : > { %v1085_v22 = vmax.f32 %v1081_v19, %v2752_v9  ;;  %vm3052_vm15 = vcmp.lt.s32.totalorder %v2746_v17, 320  ;;  %vm1685_vm1 = vmpackc.low %vm504_vm7, %vm503_vm6  ;;  %vm3066_vm6 = vcmp.lt.s32.totalorder %v2746_v17, 320 }
  0xd7   : > { %619 = vmax.xlane.f32.xlu1 %v2738_v0  ;;  %v2763_v7 = vsel %vm3052_vm15, %v413_v1, -1e+30  ;;  %v1087_v23 = vmax.f32 %v1083_v52, %v1084_v62  ;;  %v2767_v4 = vsel %vm3052_vm15, %v445_v57, 0.0  ;;  %v2772_v1 = vld [vmem:[#allocation3] sm:$0x1]  ;;  %v1106_v52 = vsub.s32 0, %v2486_v10  ;;  %vm1667_vm15 = vmpackc.low %vm498_vm2, %vm497_vm0 }
  0xd8   : > { %v1086_v24 = vmax.f32 %v1082_v20, %v2763_v7  ;;  %vm1679_vm0 = vmpackc.low %vm502_vm5, %vm501_vm4  ;;  %vm3065_vm5 = vcmp.lt.s32.totalorder %v2729_v48, 320 }
  0xd9   : > { %621 = vmax.xlane.f32.xlu0 %v2756_v21  ;;  %vm1691_vm2 = vmpackc.low %vm506_vm9, %vm505_vm8 }
  0xda   : > { %v1088_v26 = vmax.f32 %v1085_v22, %v1086_v24  ;;  %vm1697_vm3 = vmpackc.low %vm508_vm11, %vm507_vm10 }
  0xdb   : > { %623 = vmax.xlane.f32.xlu1 %v2767_v4  ;;  %vm1703_vm4 = vmpackc.low %vm510_vm13, %vm509_vm12 }
  0xdc   : > { %v1089_v19 = vmax.f32 %v1087_v23, %v1088_v26  ;;  %vm1709_vm7 = vmpackc.low %vm3066_vm6, %vm3065_vm5 }
  0xde   : > { %v1090_v27 = vrot.slane %v1089_v19, 4 }
  0xe0   : > { %v1091_v31 = vmax.f32 %v1089_v19, %v1090_v27 }
  0xe2   : > { %v1092_v37 = vrot.slane %v1091_v31, 2 }
  0xe4   : > { %v1093_v47 = vmax.f32 %v1091_v31, %v1092_v37 }
  0xe6   : > { %v1094_v56 = vrot.slane %v1093_v47, 1 }
  0xe8   : > { %v1095_v62 = vmax.f32 %v1093_v47, %v1094_v56 }
  0xea   : > { %v2776_v57 = vmax.f32 %v2772_v1, %v1095_v62 }
  0xec   : > { %v1107_v20 = vrot.slane %v2776_v57, %v1106_v52  ;;  %1180 = vst [vmem:[#allocation3] sm:$0x1] %v2776_v57 }
  0xee   : > { %v1109_v22 = vsub.f32 %v2523_v35, %v1107_v20  ;;  %v1110_v23 = vsub.f32 %v2546_v43, %v1107_v20  ;;  %v1111_v24 = vsub.f32 %v2538_v41, %v1107_v20  ;;  %v1112_v26 = vsub.f32 %v2555_v45, %v1107_v20 }
  0xef   : > { %v1113_v19 = vsub.f32 %v2579_v59, %v1107_v20  ;;  %v1114_v31 = vsub.f32 %v2598_v3, %v1107_v20  ;;  %v1115_v56 = vsub.f32 %v2613_v8, %v1107_v20  ;;  %v1116_v35 = vsub.f32 %v2625_v15, %v1107_v20 }
  0xf0   : > { %v1125_v27 = vmul.f32 1.442695, %v1109_v22  ;;  %v1127_v10 = vmul.f32 1.442695, %v1110_v23  ;;  %v1129_v37 = vmul.f32 1.442695, %v1111_v24  ;;  %v1117_v43 = vsub.f32 %v2659_v50, %v1107_v20 }
  0xf1   : > { %v1131_v47 = vmul.f32 1.442695, %v1112_v26  ;;  %v1133_v52 = vmul.f32 1.442695, %v1113_v19  ;;  %v1135_v41 = vmul.f32 1.442695, %v1114_v31  ;;  %v1118_v59 = vsub.f32 %v2674_v55, %v1107_v20 }
  0xf2   : > { %1831 = vpow2.f32 %v1125_v27  ;;  %v1137_v45 = vmul.f32 1.442695, %v1115_v56  ;;  %v1139_v3 = vmul.f32 1.442695, %v1116_v35  ;;  %v1119_v62 = vsub.f32 %v2684_v63, %v1107_v20 }
  0xf3   : > { %1833 = vpow2.f32 %v1127_v10  ;;  %v1141_v22 = vmul.f32 1.442695, %v1117_v43  ;;  %v1120_v24 = vsub.f32 %v2695_v12, %v1107_v20  ;;  %v1143_v15 = vmul.f32 1.442695, %v1118_v59 }
  0xf4   : > { %1835 = vpow2.f32 %v1129_v37  ;;  %v1121_v50 = vsub.f32 %v2719_v33, %v1107_v20  ;;  %v1145_v10 = vmul.f32 1.442695, %v1119_v62  ;;  %v1122_v37 = vsub.f32 %v2742_v16, %v1107_v20 }
  0xf5   : > { %1837 = vpow2.f32 %v1131_v47  ;;  %v1147_v63 = vmul.f32 1.442695, %v1120_v24  ;;  %v1124_v43 = vsub.f32 %v2763_v7, %v1107_v20  ;;  %v1099_v7 = vsub.f32 %v2772_v1, %v2776_v57 }
  0xf6   : > { %1839 = vpow2.f32 %v1133_v52  ;;  %v1123_v52 = vsub.f32 %v2752_v9, %v1107_v20  ;;  %v1149_v12 = vmul.f32 1.442695, %v1121_v50  ;;  %v1151_v33 = vmul.f32 1.442695, %v1122_v37 }
  0xf7   : > { %1841 = vpow2.f32 %v1135_v41 }
  0xf8   : > { %1843 = vpow2.f32 %v1137_v45 }
  0xf9   : > { %1845 = vpow2.f32 %v1139_v3  ;;  %v1153_v3 = vmul.f32 1.442695, %v1123_v52 }
  0xfa   : > { %1847 = vpow2.f32 %v1141_v22  ;;  %v1155_v22 = vmul.f32 1.442695, %v1124_v43  ;;  %v1098_v43 = vld [vmem:[#allocation4] sm:$0x1] }
  0xfb   : > { %1849 = vpow2.f32 %v1143_v15 }
  0xfc   : > { %v1832_v8 = vpop.eup %1831  ;;  %1851 = vpow2.f32 %v1145_v10  ;;  %v1100_v10 = vmul.f32 1.442695, %v1099_v7 }
  0xfd   : > { %v1834_v23 = vpop.eup %1833  ;;  %1853 = vpow2.f32 %v1147_v63 }
  0xfe   : > { %v1836_v26 = vpop.eup %1835  ;;  %v1157_v19 = vadd.f32 %v1834_v23, %v1832_v8  ;;  %1855 = vpow2.f32 %v1149_v12 }
  0xff   : > { %v1838_v27 = vpop.eup %1837  ;;  %1857 = vpow2.f32 %v1151_v33 }
 0x100   : > { %v1158_v55 = vadd.f32 %v1836_v26, %v1157_v19  ;;  %v1840_v31 = vpop.eup %1839  ;;  %1859 = vpow2.f32 %v1153_v3 }
 0x101   : > { %v1842_v56 = vpop.eup %1841  ;;  %1861 = vpow2.f32 %v1155_v22 }
 0x102   : > { %v1159_v47 = vadd.f32 %v1838_v27, %v1158_v55  ;;  %v1844_v41 = vpop.eup %1843  ;;  %1863 = vpow2.f32 %v1100_v10 }
 0x103   : > { %v1846_v59 = vpop.eup %1845 }
 0x104   : > { %v1160_v35 = vadd.f32 %v1840_v31, %v1159_v47  ;;  %v1848_v16 = vpop.eup %1847 }
 0x105   : > { %v1850_v23 = vpop.eup %1849 }
 0x106   : > { %v1161_v45 = vadd.f32 %v1842_v56, %v1160_v35  ;;  %v1852_v24 = vpop.eup %1851 }
 0x107   : > { %v1854_v26 = vpop.eup %1853 }
 0x108   : > { %v1162_v62 = vadd.f32 %v1844_v41, %v1161_v45  ;;  %v1856_v19 = vpop.eup %1855 }
 0x109   : > { %v1858_v50 = vpop.eup %1857 }
 0x10a   : > { %v1163_v8 = vadd.f32 %v1846_v59, %v1162_v62  ;;  %v1860_v31 = vpop.eup %1859 }
 0x10b   : > { %v1862_v63 = vpop.eup %1861 }
 0x10c   : > { %v1164_v9 = vadd.f32 %v1848_v16, %v1163_v8  ;;  %v1864_v41 = vpop.eup %1863 }
 0x10d   : > { %v1102_v45 = vmul.f32 %v1864_v41, %v1098_v43 }
 0x10e   : > { %v1165_v15 = vadd.f32 %v1850_v23, %v1164_v9 }
 0x110   : > { %v1166_v20 = vadd.f32 %v1852_v24, %v1165_v15 }
 0x112   : > { %v1167_v27 = vadd.f32 %v1854_v26, %v1166_v20 }
 0x114   : > { %v1168_v55 = vadd.f32 %v1856_v19, %v1167_v27 }
 0x116   : > { %v1169_v37 = vadd.f32 %v1858_v50, %v1168_v55 }
 0x118   : > { %v1170_v47 = vadd.f32 %v1860_v31, %v1169_v37 }
 0x11a   : > { %v1171_v56 = vadd.f32 %v1862_v63, %v1170_v47 }
 0x11c   : > { %v1172_v52 = vrot.slane %v1171_v56, 4 }
 0x11e   : > { %v1173_v12 = vadd.f32 %v1172_v52, %v1171_v56 }
 0x120   : > { %v1174_v35 = vrot.slane %v1173_v12, 2 }
 0x122   : > { %v1175_v33 = vadd.f32 %v1174_v35, %v1173_v12 }
 0x124   : > { %v1176_v1 = vrot.slane %v1175_v33, 1 }
 0x126   : > { %v1177_v57 = vadd.f32 %v1176_v1, %v1175_v33 }
 0x128   : > { %v1178_v59 = vadd.f32 %v1177_v57, %v1102_v45 }
 0x12a   : > { %1179 = vst [vmem:[#allocation4] sm:$0x1] %v1178_v59 }
 0x14a   : > { %v594_v3 = vpop.xlane.xlu0 %593 }
 0x14b   : > { %v625_v62 = vsub.f32 %v2519_v34, %v594_v3 }
 0x14c   : > { %v598_v16 = vpop.xlane.xlu1 %597 }
 0x14d   : > { %v641_v22 = vmul.f32 1.442695, %v625_v62  ;;  %v627_v8 = vsub.f32 %v2534_v40, %v598_v16 }
 0x14e   : > { %v596_v23 = vpop.xlane.xlu0 %595 }
 0x14f   : > { %1865 = vpow2.f32 %v641_v22  ;;  %v645_v9 = vmul.f32 1.442695, %v627_v8  ;;  %v626_v24 = vsub.f32 %v2542_v42, %v596_v23 }
 0x150   : > { %v600_v15 = vpop.xlane.xlu1 %599 }
 0x151   : > { %v643_v26 = vmul.f32 1.442695, %v626_v24  ;;  %v628_v7 = vsub.f32 %v2551_v44, %v600_v15  ;;  %1867 = vpow2.f32 %v645_v9 }
 0x152   : > { %v602_v20 = vpop.xlane.xlu0 %601 }
 0x153   : > { %1869 = vpow2.f32 %v643_v26  ;;  %v647_v19 = vmul.f32 1.442695, %v628_v7  ;;  %v629_v27 = vsub.f32 %v2575_v58, %v602_v20 }
 0x154   : > { %v604_v34 = vpop.xlane.xlu1 %603 }
 0x155   : > { %1871 = vpow2.f32 %v647_v19  ;;  %v649_v50 = vmul.f32 1.442695, %v629_v27  ;;  %v630_v40 = vsub.f32 %v2594_v2, %v604_v34 }
 0x156   : > { %v606_v10 = vpop.xlane.xlu0 %605 }
 0x157   : > { %1873 = vpow2.f32 %v649_v50  ;;  %v651_v55 = vmul.f32 1.442695, %v630_v40  ;;  %v631_v42 = vsub.f32 %v2609_v6, %v606_v10  ;;  %v446_v40 = vld [vmem:[%s2473_s6] sm:$0xff]  ;;  %v447_v10 = vld [vmem:[%s2473_s6 + $0x8] sm:$0xff] }
 0x158   : > { %v608_v31 = vpop.xlane.xlu1 %607 }
 0x159   : > { %v2805_v37 = vpop.eup %1865  ;;  %1875 = vpow2.f32 %v651_v55  ;;  %v653_v44 = vmul.f32 1.442695, %v631_v42  ;;  %v632_v63 = vsub.f32 %v2621_v14, %v608_v31  ;;  %v1666_v55 = vpack.c.bf16 %v447_v10, %v446_v40  ;;  %v448_v42 = vld [vmem:[%s2473_s6 + $0x10] sm:$0xff]  ;;  %v449_v31 = vld [vmem:[%s2473_s6 + $0x18] sm:$0xff] }
 0x15a   : > { %1570 = vmatprep.mubr.f32.mxu0 %v2805_v37  ;;  %v610_v58 = vpop.xlane.xlu0 %609 }
 0x15b   : > { %1877 = vpow2.f32 %v653_v44  ;;  %v655_v47 = vmul.f32 1.442695, %v632_v63  ;;  %v633_v56 = vsub.f32 %v2655_v49, %v610_v58  ;;  %v2810_v2 = vpop.eup %1867  ;;  %v1672_v44 = vpack.c.bf16 %v449_v31, %v448_v42  ;;  %v450_v63 = vld [vmem:[%s2473_s6 + $0x20] sm:$0xff]  ;;  %v451_v58 = vld [vmem:[%s2473_s6 + $0x28] sm:$0xff]  ;;  %1668 = vmatprep.subr.msk.bf16.mxu1 %vm1667_vm15, %v1666_v55 }
 0x15c   : > { %v612_v52 = vpop.xlane.xlu1 %611  ;;  %1671 = vmatpush3.bf16.msk.msra.mxu1 %vm1667_vm15, %v1666_v55  ;;  %v1678_v18 = vpack.c.bf16 %v451_v58, %v450_v63 }
 0x15d   : > { %v2812_v12 = vpop.eup %1869  ;;  %1879 = vpow2.f32 %v655_v47  ;;  %v657_v6 = vmul.f32 1.442695, %v633_v56  ;;  %v634_v35 = vsub.f32 %v2670_v53, %v612_v52  ;;  %1674 = vmatprep.subr.msk.bf16.mxu1 %vm1673_vm14, %v1672_v44  ;;  %v453_v47 = vld [vmem:[%s2473_s6 + $0x38] sm:$0xff]  ;;  %v455_v56 = vld [vmem:[%s2473_s6 + $0x48] sm:$0xff] }
 0x15e   : > { %1571 = vmatmul.mubr.f32.vlgmr.msra.gmra.mrb[0].mxu0 %v2812_v12  ;;  %v614_v41 = vpop.xlane.xlu0 %613  ;;  %v1684_v28 = vpack.c.bf16 %v453_v47, %v452_v29  ;;  %v1690_v46 = vpack.c.bf16 %v455_v56, %v454_v30  ;;  %v457_v52 = vld [vmem:[%s2473_s6 + $0x58] sm:$0xff] }
 0x15f   : > { %v2816_v14 = vpop.eup %1871  ;;  %1881 = vpow2.f32 %v657_v6  ;;  %v659_v43 = vmul.f32 1.442695, %v634_v35  ;;  %1573 = vmatprep.mubr.f32.mxu0 %v2810_v2  ;;  %v635_v49 = vsub.f32 %v2691_v11, %v614_v41  ;;  %v1696_v6 = vpack.c.bf16 %v457_v52, %v456_v54 }
 0x160   : > { %v616_v33 = vpop.xlane.xlu1 %615  ;;  %1677 = vmatpush3.bf16.msk.msra.mxu1 %vm1673_vm14, %v1672_v44  ;;  %v1702_v35 = vpack.c.bf16 %v459_v61, %v458_v60 }
 0x161   : > { %v2820_v45 = vpop.eup %1873  ;;  %1883 = vpow2.f32 %v659_v43  ;;  %v661_v1 = vmul.f32 1.442695, %v635_v49  ;;  %v636_v57 = vsub.f32 %v2706_v13, %v616_v33  ;;  %1680 = vmatprep.subr.msk.bf16.mxu1 %vm1679_vm0, %v1678_v18 }
 0x162   : > { %1574 = vmatmul.mubr.f32.gmra.mrb[2].mxu0 %v2816_v14  ;;  %v618_v53 = vpop.xlane.xlu0 %617 }
 0x163   : > { %v2824_v59 = vpop.eup %1875  ;;  %1885 = vpow2.f32 %v661_v1  ;;  %v663_v3 = vmul.f32 1.442695, %v636_v57  ;;  %1576 = vmatprep.mubr.f32.mxu0 %v2820_v45  ;;  %v637_v62 = vsub.f32 %v2726_v39, %v618_v53  ;;  %v460_v1 = vld [vmem:[%s2473_s6 + $0x70] sm:$0xff]  ;;  %v461_v57 = vld [vmem:[%s2473_s6 + $0x78] sm:$0xff] }
 0x164   : > { %v620_v16 = vpop.xlane.xlu1 %619  ;;  %1683 = vmatpush3.bf16.msk.msra.mxu1 %vm1679_vm0, %v1678_v18 }
 0x165   : > { %v2828_v11 = vpop.eup %1877  ;;  %1887 = vpow2.f32 %v663_v3  ;;  %v665_v22 = vmul.f32 1.442695, %v637_v62  ;;  %v638_v8 = vsub.f32 %v2738_v0, %v620_v16  ;;  %1686 = vmatprep.subr.msk.bf16.mxu1 %vm1685_vm1, %v1684_v28  ;;  %v1708_v3 = vpack.c.bf16 %v461_v57, %v460_v1  ;;  %v852_v1 = vld [vmem:[#allocation2 + $0x10] sm:$0xff] }
 0x166   : > { %1577 = vmatmul.mubr.f32.gmra.mrb[4].mxu0 %v2824_v59  ;;  %v622_v13 = vpop.xlane.xlu0 %621 }
 0x167   : > { %v2832_v23 = vpop.eup %1879  ;;  %1889 = vpow2.f32 %v665_v22  ;;  %v667_v9 = vmul.f32 1.442695, %v638_v8  ;;  %1579 = vmatprep.mubr.f32.mxu0 %v2828_v11  ;;  %v639_v24 = vsub.f32 %v2756_v21, %v622_v13 }
 0x168   : > { %v624_v15 = vpop.xlane.xlu1 %623  ;;  %1689 = vmatpush3.bf16.msk.msra.mxu1 %vm1685_vm1, %v1684_v28 }
 0x169   : > { %v2836_v39 = vpop.eup %1881  ;;  %1891 = vpow2.f32 %v667_v9  ;;  %v669_v26 = vmul.f32 1.442695, %v639_v24  ;;  %v640_v7 = vsub.f32 %v2767_v4, %v624_v15  ;;  %1692 = vmatprep.subr.msk.bf16.mxu1 %vm1691_vm2, %v1690_v46 }
 0x16a   : > { %1580 = vmatmul.mubr.f32.gmra.mrb[6].mxu0 %v2832_v23 }
 0x16b   : > { %v2840_v0 = vpop.eup %1883  ;;  %1893 = vpow2.f32 %v669_v26  ;;  %v671_v20 = vmul.f32 1.442695, %v640_v7  ;;  %1582 = vmatprep.mubr.f32.mxu0 %v2836_v39 }
 0x16c   : > { %1695 = vmatpush3.bf16.msk.msra.mxu1 %vm1691_vm2, %v1690_v46 }
 0x16d   : > { %v2843_v19 = vpop.eup %1885  ;;  %1895 = vpow2.f32 %v671_v20  ;;  %1698 = vmatprep.subr.msk.bf16.mxu1 %vm1697_vm3, %v1696_v6 }
 0x16e   : > { %1583 = vmatmul.mubr.f32.gmra.mrb[8].mxu0 %v2840_v0 }
 0x16f   : > { %v2846_v21 = vpop.eup %1887  ;;  %1585 = vmatprep.mubr.f32.mxu0 %v2843_v19 }
 0x170   : > { %1701 = vmatpush3.bf16.msk.msra.mxu1 %vm1697_vm3, %v1696_v6 }
 0x171   : > { %v2849_v4 = vpop.eup %1889  ;;  %1704 = vmatprep.subr.msk.bf16.mxu1 %vm1703_vm4, %v1702_v35 }
 0x172   : > { %1586 = vmatmul.mubr.f32.gmra.mrb[10].mxu0 %v2846_v21 }
 0x173   : > { %v2852_v27 = vpop.eup %1891  ;;  %1588 = vmatprep.mubr.f32.mxu0 %v2849_v4 }
 0x174   : > { %1707 = vmatpush3.bf16.msk.msra.mxu1 %vm1703_vm4, %v1702_v35 }
 0x175   : > { %v2855_v34 = vpop.eup %1893  ;;  %1710 = vmatprep.subr.msk.bf16.mxu1 %vm1709_vm7, %v1708_v3 }
 0x176   : > { %1589 = vmatmul.mubr.f32.gmra.mrb[12].mxu0 %v2852_v27 }
 0x177   : > { %v2858_v50 = vpop.eup %1895  ;;  %1591 = vmatprep.mubr.f32.mxu0 %v2855_v34 }
 0x178   : > { %1713 = vmatpush3.bf16.msk.msra.mxu1 %vm1709_vm7, %v1708_v3 }
 0x17a   : > { %1592 = vmatmul.mubr.f32.gmra.mrb[14].mxu0 %v2858_v50 }
 0x231   : > { %v1572_v25 = vpop.f32.mrb[0].mxu0 }
 0x232   : > { %v739_v32 = vpop.f32.mrb[1].mxu0 }
 0x233   : > { %1897 = vrcp.f32 %v739_v32 }
 0x234   : > { %1899 = vrcp.f32 %v1572_v25 }
 0x235   : > { %v1575_v38 = vpop.f32.mrb[2].mxu0 }
 0x236   : > { %v749_v51 = vpop.f32.mrb[3].mxu0 }
 0x237   : > { %1901 = vrcp.f32 %v749_v51  ;;  %v851_v51 = vld [vmem:[#allocation2 + $0x8] sm:$0xff] }
 0x238   : > { %1903 = vrcp.f32 %v1575_v38 }
 0x239   : > { %v1578_v41 = vpop.f32.mrb[4].mxu0 }
 0x23a   : > { %v759_v43 = vpop.f32.mrb[5].mxu0 }
 0x23b   : > { %1905 = vrcp.f32 %v759_v43 }
 0x23c   : > { %1907 = vrcp.f32 %v1578_v41  ;;  %v850_v41 = vld [vmem:[#allocation2] sm:$0xff] }
 0x23d   : > { %v1898_v49 = vpop.eup %1897  ;;  %v1581_v5 = vpop.f32.mrb[6].mxu0 }
 0x23e   : > { %v769_v33 = vpop.f32.mrb[7].mxu0  ;;  %v834_v36 = vmul.f32 %v1898_v49, %v2805_v37  ;;  %v1900_v53 = vpop.eup %1899 }
 0x23f   : > { %v835_v22 = vmul.f32 %v1900_v53, %v2812_v12  ;;  %1909 = vrcp.f32 %v769_v33 }
 0x240   : > { %866 = vxpose.xlu0.b32.start [1/16] %v834_v36, 128  ;;  %1911 = vrcp.f32 %v1581_v5  ;;  %v853_v36 = vld [vmem:[#allocation2 + $0x18] sm:$0xff] }
 0x241   : > { %v1584_v62 = vpop.f32.mrb[8].mxu0  ;;  %v1902_v8 = vpop.eup %1901 }
 0x242   : > { %v779_v16 = vpop.f32.mrb[9].mxu0  ;;  %v836_v9 = vmul.f32 %v1902_v8, %v2810_v2  ;;  %v1904_v24 = vpop.eup %1903 }
 0x243   : > { %v837_v15 = vmul.f32 %v1904_v24, %v2816_v14  ;;  %1913 = vrcp.f32 %v779_v16  ;;  %v855_v16 = vld [vmem:[#allocation2 + $0x28] sm:$0xff]  ;;  %v857_v24 = vld [vmem:[#allocation2 + $0x38] sm:$0xff] }
 0x244   : > { %867 = vxpose.xlu0.b32.cont [2/16] %v835_v22, 128  ;;  %1915 = vrcp.f32 %v1584_v62  ;;  %v854_v22 = vld [vmem:[#allocation2 + $0x20] sm:$0xff] }
 0x245   : > { %v1587_v37 = vpop.f32.mrb[10].mxu0  ;;  %v1906_v26 = vpop.eup %1905 }
 0x246   : > { %v789_v13 = vpop.f32.mrb[11].mxu0  ;;  %v838_v20 = vmul.f32 %v1906_v26, %v2820_v45  ;;  %v1908_v40 = vpop.eup %1907 }
 0x247   : > { %v839_v10 = vmul.f32 %v1908_v40, %v2824_v59  ;;  %1917 = vrcp.f32 %v789_v13 }
 0x248   : > { %868 = vxpose.xlu0.b32.cont [3/16] %v836_v9, 128  ;;  %1919 = vrcp.f32 %v1587_v37 }
 0x249   : > { %v1590_v48 = vpop.f32.mrb[12].mxu0  ;;  %v1910_v2 = vpop.eup %1909 }
 0x24a   : > { %v799_v17 = vpop.f32.mrb[13].mxu0  ;;  %v840_v55 = vmul.f32 %v1910_v2, %v2828_v11  ;;  %v1912_v42 = vpop.eup %1911 }
 0x24b   : > { %v841_v14 = vmul.f32 %v1912_v42, %v2832_v23  ;;  %1921 = vrcp.f32 %v799_v17  ;;  %v861_v42 = vld [vmem:[#allocation2 + $0x58] sm:$0xff] }
 0x24c   : > { %869 = vxpose.xlu0.b32.cont [4/16] %v837_v15, 128  ;;  %1923 = vrcp.f32 %v1590_v48  ;;  %v856_v48 = vld [vmem:[#allocation2 + $0x30] sm:$0xff] }
 0x24d   : > { %v1593_v7 = vpop.f32.mrb[14].mxu0  ;;  %v1914_v31 = vpop.eup %1913 }
 0x24e   : > { %v809_v12 = vpop.f32.mrb[15].mxu0  ;;  %v842_v45 = vmul.f32 %v1914_v31, %v2836_v39  ;;  %v1916_v44 = vpop.eup %1915 }
 0x24f   : > { %v843_v59 = vmul.f32 %v1916_v44, %v2840_v0  ;;  %1925 = vrcp.f32 %v809_v12  ;;  %v859_v12 = vld [vmem:[#allocation2 + $0x48] sm:$0xff] }
 0x250   : > { %870 = vxpose.xlu0.b32.cont [5/16] %v838_v20, 128  ;;  %1927 = vrcp.f32 %v1593_v7  ;;  %v858_v20 = vld [vmem:[#allocation2 + $0x40] sm:$0xff] }
 0x251   : > { %v1918_v63 = vpop.eup %1917 }
 0x252   : > { %v844_v11 = vmul.f32 %v1918_v63, %v2843_v19  ;;  %v1920_v58 = vpop.eup %1919  ;;  %v863_v63 = vld [vmem:[#allocation2 + $0x68] sm:$0xff] }
 0x253   : > { %v845_v23 = vmul.f32 %v1920_v58, %v2846_v21 }
 0x254   : > { %871 = vxpose.xlu0.b32.cont [6/16] %v839_v10, 128 }
 0x255   : > { %v1922_v18 = vpop.eup %1921 }
 0x256   : > { %v846_v39 = vmul.f32 %v1922_v18, %v2849_v4  ;;  %v1924_v29 = vpop.eup %1923 }
 0x257   : > { %v847_v47 = vmul.f32 %v1924_v29, %v2852_v27  ;;  %v865_v29 = vld [vmem:[#allocation2 + $0x78] sm:$0xff] }
 0x258   : > { %872 = vxpose.xlu0.b32.cont [7/16] %v840_v55, 128 }
 0x259   : > { %v1926_v0 = vpop.eup %1925 }
 0x25a   : > { %v848_v28 = vmul.f32 %v1926_v0, %v2855_v34  ;;  %v1928_v30 = vpop.eup %1927 }
 0x25b   : > { %v849_v19 = vmul.f32 %v1928_v30, %v2858_v50 }
 0x25c   : > { %873 = vxpose.xlu0.b32.cont [8/16] %v841_v14, 128  ;;  %v860_v14 = vld [vmem:[#allocation2 + $0x50] sm:$0xff] }
 0x260   : > { %874 = vxpose.xlu0.b32.cont [9/16] %v842_v45, 128 }
 0x264   : > { %875 = vxpose.xlu0.b32.cont [10/16] %v843_v59, 128 }
 0x268   : > { %876 = vxpose.xlu0.b32.cont [11/16] %v844_v11, 128  ;;  %v862_v11 = vld [vmem:[#allocation2 + $0x60] sm:$0xff] }
 0x26c   : > { %877 = vxpose.xlu0.b32.cont [12/16] %v845_v23, 128 }
 0x270   : > { %878 = vxpose.xlu0.b32.cont [13/16] %v846_v39, 128 }
 0x274   : > { %879 = vxpose.xlu0.b32.cont [14/16] %v847_v47, 128  ;;  %v864_v47 = vld [vmem:[#allocation2 + $0x70] sm:$0xff] }
 0x278   : > { %880 = vxpose.xlu0.b32.cont [15/16] %v848_v28, 128 }
 0x27c   : > { %881 = vxpose.xlu0.b32.end [16/16] %v849_v19, 128 }
 0x2c0   : > { %v882_v56 = vpop.trf.xlu0 }
 0x2c1   : > { %1626 = vmatprep.mubr.f32.mxu1 %v882_v56 }
 0x2c4   : > { %v883_v21 = vpop.trf.xlu0 }
 0x2c5   : > { %1627 = vmatmul.mubr.f32.vlgmr.msra.gmra.mrb[0].mxu1 %v883_v21 }
 0x2c8   : > { %v884_v46 = vpop.trf.xlu0 }
 0x2c9   : > { %1629 = vmatprep.mubr.f32.mxu1 %v884_v46 }
 0x2cc   : > { %v885_v4 = vpop.trf.xlu0 }
 0x2cd   : > { %1630 = vmatmul.mubr.f32.gmra.mrb[2].mxu1 %v885_v4 }
 0x2d0   : > { %v886_v54 = vpop.trf.xlu0 }
 0x2d1   : > { %1632 = vmatprep.mubr.f32.mxu1 %v886_v54 }
 0x2d4   : > { %v887_v27 = vpop.trf.xlu0 }
 0x2d5   : > { %1633 = vmatmul.mubr.f32.gmra.mrb[4].mxu1 %v887_v27 }
 0x2d8   : > { %v888_v52 = vpop.trf.xlu0 }
 0x2d9   : > { %1635 = vmatprep.mubr.f32.mxu1 %v888_v52 }
 0x2dc   : > { %v889_v34 = vpop.trf.xlu0 }
 0x2dd   : > { %1636 = vmatmul.mubr.f32.gmra.mrb[6].mxu1 %v889_v34 }
 0x2e0   : > { %v890_v6 = vpop.trf.xlu0 }
 0x2e1   : > { %1638 = vmatprep.mubr.f32.mxu1 %v890_v6 }
 0x2e4   : > { %v891_v50 = vpop.trf.xlu0 }
 0x2e5   : > { %1639 = vmatmul.mubr.f32.gmra.mrb[8].mxu1 %v891_v50 }
 0x2e8   : > { %v892_v60 = vpop.trf.xlu0 }
 0x2e9   : > { %1641 = vmatprep.mubr.f32.mxu1 %v892_v60 }
 0x2ec   : > { %v893_v61 = vpop.trf.xlu0 }
 0x2ed   : > { %1642 = vmatmul.mubr.f32.gmra.mrb[10].mxu1 %v893_v61 }
 0x2f0   : > { %v894_v35 = vpop.trf.xlu0 }
 0x2f1   : > { %1644 = vmatprep.mubr.f32.mxu1 %v894_v35 }
 0x2f4   : > { %v895_v25 = vpop.trf.xlu0 }
 0x2f5   : > { %1645 = vmatmul.mubr.f32.gmra.mrb[12].mxu1 %v895_v25 }
 0x2f8   : > { %v896_v32 = vpop.trf.xlu0 }
 0x2f9   : > { %1647 = vmatprep.mubr.f32.mxu1 %v896_v32 }
 0x2fc   : > { %v897_v38 = vpop.trf.xlu0 }
 0x2fd   : > { %1648 = vmatmul.mubr.f32.gmra.mrb[14].mxu1 %v897_v38 }
 0x398   : > { %v1628_v43 = vpop.f32.mrb[0].mxu1 }
 0x399   : > { %v1044_v49 = vadd.f32 %v1628_v43, %v851_v51  ;;  %v964_v5 = vpop.f32.mrb[1].mxu1  ;;  %v1218_v51 = vld [vmem:[#allocation4] sm:$0x1] (!%p1466_p7)  ;;  %v1217_v43 = vld [vmem:[#allocation3] sm:$0x1] (!%p1466_p7) }
 0x39a   : > { %v1043_v33 = vadd.f32 %v964_v5, %v850_v41  ;;  %1929 = vlog2.f32 (!%p1466_p7), %v1218_v51 }
 0x39b   : > { %1060 = vst [vmem:[#allocation2 + $0x8] sm:$0xff] %v1044_v49 }
 0x39c   : > { %1059 = vst [vmem:[#allocation2] sm:$0xff] %v1043_v33 }
 0x3a0   : > { %v1631_v57 = vpop.f32.mrb[2].mxu1 }
 0x3a1   : > { %v1046_v53 = vadd.f32 %v1631_v57, %v853_v36  ;;  %v974_v3 = vpop.f32.mrb[3].mxu1 }
 0x3a2   : > { %v1045_v62 = vadd.f32 %v974_v3, %v852_v1  ;;  %v1186_v21 = vld [vmem:[#allocation2 + $0x8] sm:$0xff] (!%p1466_p7) }
 0x3a3   : > { %1062 = vst [vmem:[#allocation2 + $0x18] sm:$0xff] %v1046_v53  ;;  %v1185_v56 = vld [vmem:[#allocation2] sm:$0xff] (!%p1466_p7)  ;;  %1202 = vst [vmem:[%s2475_s30 + $0x8] sm:$0xff] (!%p1466_p7), %v1186_v21 }
 0x3a4   : > { %1061 = vst [vmem:[#allocation2 + $0x10] sm:$0xff] %v1045_v62  ;;  %1201 = vst [vmem:[%s2475_s30] sm:$0xff] (!%p1466_p7), %v1185_v56  ;;  %v1930_v41 = vpop.eup (!%p1466_p7), %1929 }
 0x3a5   : > { %v1220_v49 = vmul.f32 (!%p1466_p7), 0.6931472, %v1930_v41 }
 0x3a7   : > { %v1221_v5 = vadd.f32 (!%p1466_p7), %v1220_v49, %v1217_v43 }
 0x3a8   : > { %v1634_v8 = vpop.f32.mrb[4].mxu1 }
 0x3a9   : > { %v1048_v37 = vadd.f32 %v1634_v8, %v855_v16  ;;  %v984_v13 = vpop.f32.mrb[5].mxu1  ;;  %1222 = vst [vmem:[%s344_s17] sm:$0x1] (!%p1466_p7), %v1221_v5 }
 0x3aa   : > { %v1047_v9 = vadd.f32 %v984_v13, %v854_v22  ;;  %v1188_v4 = vld [vmem:[#allocation2 + $0x18] sm:$0xff] (!%p1466_p7) }
 0x3ab   : > { %1064 = vst [vmem:[#allocation2 + $0x28] sm:$0xff] %v1048_v37  ;;  %v1187_v46 = vld [vmem:[#allocation2 + $0x10] sm:$0xff] (!%p1466_p7)  ;;  %1204 = vst [vmem:[%s2475_s30 + $0x18] sm:$0xff] (!%p1466_p7), %v1188_v4 }
 0x3ac   : > { %1063 = vst [vmem:[#allocation2 + $0x20] sm:$0xff] %v1047_v9  ;;  %1203 = vst [vmem:[%s2475_s30 + $0x10] sm:$0xff] (!%p1466_p7), %v1187_v46 }
 0x3b0   : > { %v1637_v17 = vpop.f32.mrb[6].mxu1 }
 0x3b1   : > { %v1050_v15 = vadd.f32 %v1637_v17, %v857_v24  ;;  %v994_v26 = vpop.f32.mrb[7].mxu1 }
 0x3b2   : > { %v1049_v7 = vadd.f32 %v994_v26, %v856_v48  ;;  %v1190_v27 = vld [vmem:[#allocation2 + $0x28] sm:$0xff] (!%p1466_p7) }
 0x3b3   : > { %1066 = vst [vmem:[#allocation2 + $0x38] sm:$0xff] %v1050_v15  ;;  %v1189_v54 = vld [vmem:[#allocation2 + $0x20] sm:$0xff] (!%p1466_p7)  ;;  %1206 = vst [vmem:[%s2475_s30 + $0x28] sm:$0xff] (!%p1466_p7), %v1190_v27 }
 0x3b4   : > { %1065 = vst [vmem:[#allocation2 + $0x30] sm:$0xff] %v1049_v7  ;;  %1205 = vst [vmem:[%s2475_s30 + $0x20] sm:$0xff] (!%p1466_p7), %v1189_v54 }
 0x3b8   : > { %v1640_v40 = vpop.f32.mrb[8].mxu1 }
 0x3b9   : > { %v1052_v10 = vadd.f32 %v1640_v40, %v859_v12  ;;  %v1004_v2 = vpop.f32.mrb[9].mxu1 }
 0x3ba   : > { %v1051_v55 = vadd.f32 %v1004_v2, %v858_v20  ;;  %v1192_v34 = vld [vmem:[#allocation2 + $0x38] sm:$0xff] (!%p1466_p7) }
 0x3bb   : > { %1068 = vst [vmem:[#allocation2 + $0x48] sm:$0xff] %v1052_v10  ;;  %v1191_v52 = vld [vmem:[#allocation2 + $0x30] sm:$0xff] (!%p1466_p7)  ;;  %1208 = vst [vmem:[%s2475_s30 + $0x38] sm:$0xff] (!%p1466_p7), %v1192_v34 }
 0x3bc   : > { %1067 = vst [vmem:[#allocation2 + $0x40] sm:$0xff] %v1051_v55  ;;  %1207 = vst [vmem:[%s2475_s30 + $0x30] sm:$0xff] (!%p1466_p7), %v1191_v52 }
 0x3c0   : > { %v1643_v31 = vpop.f32.mrb[10].mxu1 }
 0x3c1   : > { %v1054_v45 = vadd.f32 %v1643_v31, %v861_v42  ;;  %v1014_v44 = vpop.f32.mrb[11].mxu1 }
 0x3c2   : > { %v1053_v59 = vadd.f32 %v1014_v44, %v860_v14  ;;  %v1194_v50 = vld [vmem:[#allocation2 + $0x48] sm:$0xff] (!%p1466_p7) }
 0x3c3   : > { %1070 = vst [vmem:[#allocation2 + $0x58] sm:$0xff] %v1054_v45  ;;  %v1193_v6 = vld [vmem:[#allocation2 + $0x40] sm:$0xff] (!%p1466_p7)  ;;  %1210 = vst [vmem:[%s2475_s30 + $0x48] sm:$0xff] (!%p1466_p7), %v1194_v50 }
 0x3c4   : > { %1069 = vst [vmem:[#allocation2 + $0x50] sm:$0xff] %v1053_v59  ;;  %1209 = vst [vmem:[%s2475_s30 + $0x40] sm:$0xff] (!%p1466_p7), %v1193_v6 }
 0x3c8   : > { %v1646_v58 = vpop.f32.mrb[12].mxu1 }
 0x3c9   : > { %v1056_v23 = vadd.f32 %v1646_v58, %v863_v63  ;;  %v1024_v18 = vpop.f32.mrb[13].mxu1 }
 0x3ca   : > { %v1055_v39 = vadd.f32 %v1024_v18, %v862_v11  ;;  %v1196_v61 = vld [vmem:[#allocation2 + $0x58] sm:$0xff] (!%p1466_p7) }
 0x3cb   : > { %1072 = vst [vmem:[#allocation2 + $0x68] sm:$0xff] %v1056_v23  ;;  %v1195_v60 = vld [vmem:[#allocation2 + $0x50] sm:$0xff] (!%p1466_p7)  ;;  %1212 = vst [vmem:[%s2475_s30 + $0x58] sm:$0xff] (!%p1466_p7), %v1196_v61 }
 0x3cc   : > { %1071 = vst [vmem:[#allocation2 + $0x60] sm:$0xff] %v1055_v39  ;;  %1211 = vst [vmem:[%s2475_s30 + $0x50] sm:$0xff] (!%p1466_p7), %v1195_v60 }
 0x3ce   : > { %1184 = sbr.rel (%p1466_p7) target bundleno = 989 (0x3dd), region = 52 }
 0x3d0   : > { %v1649_v0 = vpop.f32.mrb[14].mxu1 }
 0x3d1   : > { %v1058_v28 = vadd.f32 %v1649_v0, %v865_v29  ;;  %v1034_v30 = vpop.f32.mrb[15].mxu1 }
 0x3d2   : > { %v1057_v19 = vadd.f32 %v1034_v30, %v864_v47  ;;  %v1198_v25 = vld [vmem:[#allocation2 + $0x68] sm:$0xff] (!%p1466_p7) }
 0x3d3   : > { %1074 = vst [vmem:[#allocation2 + $0x78] sm:$0xff] %v1058_v28  ;;  %v1197_v35 = vld [vmem:[#allocation2 + $0x60] sm:$0xff] (!%p1466_p7)  ;;  %1214 = vst [vmem:[%s2475_s30 + $0x68] sm:$0xff] (!%p1466_p7), %v1198_v25 }
 0x3d4   : > { %1073 = vst [vmem:[#allocation2 + $0x70] sm:$0xff] %v1057_v19  ;;  %1213 = vst [vmem:[%s2475_s30 + $0x60] sm:$0xff] (!%p1466_p7), %v1197_v35 }
 0x3da   : > { %v1200_v38 = vld [vmem:[#allocation2 + $0x78] sm:$0xff] }
 0x3db   : > { %v1199_v32 = vld [vmem:[#allocation2 + $0x70] sm:$0xff]  ;;  %1216 = vst [vmem:[%s2475_s30 + $0x78] sm:$0xff] %v1200_v38 }
 0x3dc   : > { %1215 = vst [vmem:[%s2475_s30 + $0x70] sm:$0xff] %v1199_v32 }
 0x3dd PF: > { %s1473_s21 = sshll.u32 %s2161_s22, 11  ;;  %s1241_s27 = sshll.u32 %s2475_s30, 4  ;;  %s2952_s27 = int_to_ptr.vmem [resolvable:$true] %s1241_s27 }
 0x3de   : > { %s2949_s5 = scalar_lea.hbm %s3044_s3, %s1473_s21  ;;  %s1224_s15 = scalar_lea.sflag [#allocation7], %s2470_s12 }
 0x3df   : > { %s2015_s10 = scalar_lea.vmem %s2952_s27, 2048  ;;  %p3067_p2 = scmp.ne.s32.totalorder %s3060_s11, 0 }
 0x3e0   : > { %p2016_p9 = scmp.ne.s32.totalorder %s2952_s27, %s2015_s10  ;;  %s2187_s13 = smov [#allocation11]  }
 0x3e1   : > { %s2019_s7 = sshll.u32 %s2187_s13, 4  ;;  %s2020_s7 = int_to_ptr.vmem [resolvable:$false] %s2019_s7 }
 0x3e2   : > { %p2017_p4 = pnand %p2016_p9, %p3067_p2  ;;  %s2021_s18 = scalar_lea.vmem %s2020_s7, 4096 }
 0x3e3   : > { %p2022_p0 = scmp.lt.s32.totalorder %s2952_s27, %s2020_s7  ;;  %p2023_p1 = scmp.lt.s32.totalorder %s2021_s18, %s2015_s10 }
 0x3e4   : > { %p2018_p6 = pneg %p2017_p4 }
 0x3e5   : > { %p2024_p8 = por %p2023_p1, %p2022_p0 }
 0x3e7   : > { %p2025_p11 = pnand %p2024_p8, %p2018_p6 }
 0x3e9   : > { %2028 = shalt.err (!%p2025_p11)
}
 0x3ea   : > { %s2029_s28 = scalar_lea.hbm %s2949_s5, 2048  ;;  %s2033_s6 = scalar_lea.hbm %s3044_s3, 4096 }
 0x3eb   : > { %p2030_p13 = scmp.ne.s32.totalorder %s2949_s5, %s2029_s28  ;;  %p2034_p5 = scmp.lt.u32.totalorder %s2949_s5, %s3044_s3 }
 0x3ec   : > { %p2035_p3 = scmp.lt.u32.totalorder %s2033_s6, %s2029_s28  ;;  %p2037_p9 = scmp.lt.u32.totalorder %s2029_s28, %s2949_s5 }
 0x3ed   : > { %p2031_p10 = pnand %p2030_p13, %p3067_p2 }
 0x3ee   : > { %p2036_p7 = por %p2035_p3, %p2034_p5 }
 0x3ef   : > { %p2032_p12 = pneg %p2031_p10 }
 0x3f0   : > { %p2038_p4 = por %p2037_p9, %p2036_p7 }
 0x3f2   : > { %p2039_p6 = pnand %p2038_p4, %p2032_p12 }
 0x3f4   : > { %2042 = shalt.err (!%p2039_p6)
}
 0x3f5   : > { %s2188_s21 = smov 128   ;;  %s2189_s8 = smov 8  }
 0x3f6   : > { %1720 = dma.vmem_to_hbm [thread:$0]  (%p3067_p2), %s2952_s27, 2048, %s2949_s5, %s1224_s15, %s2188_s21, %s2188_s21, %s2189_s8  }
 0x3f7   : > { %s1470_s29 = sshll.u32 %s2161_s22, 4  ;;  %s1257_s10 = sshll.u32 %s344_s17, 4  ;;  %s1258_s10 = int_to_ptr.vmem [resolvable:$true] %s1257_s10 }
 0x3f8   : > { %s2984_s18 = scalar_lea.hbm %s3045_s4, %s1470_s29  ;;  %s1229_s28 = scalar_lea.sflag [#allocation13], %s2470_s12 }
 0x3f9   : > { %s2043_s9 = scalar_lea.vmem %s1258_s10, 16  ;;  %s2190_s14 = smov [#allocation12]  }
 0x3fa   : > { %p2044_p0 = scmp.ne.s32.totalorder %s1258_s10, %s2043_s9  ;;  %s2047_s6 = sshll.u32 %s2190_s14, 4  ;;  %s2048_s6 = int_to_ptr.vmem [resolvable:$false] %s2047_s6 }
 0x3fb   : > { %s2049_s30 = scalar_lea.vmem %s2048_s6, 32  ;;  %p2050_p11 = scmp.lt.s32.totalorder %s1258_s10, %s2048_s6 }
 0x3fc   : > { %p2045_p1 = pnand %p2044_p0, %p3067_p2  ;;  %p2051_p13 = scmp.lt.s32.totalorder %s2049_s30, %s2043_s9 }
 0x3fe   : > { %p2046_p8 = pneg %p2045_p1  ;;  %p2052_p10 = por %p2051_p13, %p2050_p11 }
 0x400   : > { %p2053_p12 = pnand %p2052_p10, %p2046_p8 }
 0x402   : > { %2056 = shalt.err (!%p2053_p12)
}
 0x403   : > { %s2057_s22 = scalar_lea.hbm %s2984_s18, 16  ;;  %s2061_s5 = scalar_lea.hbm %s3045_s4, 32 }
 0x404   : > { %p2058_p5 = scmp.ne.s32.totalorder %s2984_s18, %s2057_s22  ;;  %p2062_p9 = scmp.lt.u32.totalorder %s2984_s18, %s3045_s4 }
 0x405   : > { %p2063_p4 = scmp.lt.u32.totalorder %s2061_s5, %s2057_s22  ;;  %p2065_p0 = scmp.lt.u32.totalorder %s2057_s22, %s2984_s18 }
 0x406   : > { %p2059_p3 = pnand %p2058_p5, %p3067_p2 }
 0x407   : > { %p2064_p6 = por %p2063_p4, %p2062_p9 }
 0x408   : > { %p2060_p7 = pneg %p2059_p3 }
 0x409   : > { %p2066_p1 = por %p2065_p0, %p2064_p6 }
 0x40b   : > { %p2067_p8 = pnand %p2066_p1, %p2060_p7 }
 0x40d   : > { %2070 = shalt.err (!%p2067_p8)
}
 0x40e   : > { %1721 = dma.vmem_to_hbm [thread:$0]  (%p3067_p2), %s1258_s10, 16, %s2984_s18, %s1229_s28  }
 0x40f PF: > { %s3068_s26 = sld [smem:[#allocation18_spill]]  ;;  %s3069_s21 = sld [smem:[#allocation24_spill]] }
 0x410   : > { %p1731_p11 = scmp.ge.s32.totalorder %s2173_s25, 2 }
 0x415   : > { %s1269_s8 = sand.u32 1, %s3068_s26   ;;  %p3070_p13 = scmp.ne.s32.totalorder %s3069_s21, 0 }
 0x416   : > { %s1270_s29 = scalar_lea.sflag [#allocation7], %s1269_s8 }
 0x417   : > { %p1725_p10 = pnand %p1731_p11, %p3070_p13 }
 0x419   : > { %2124 = dma.done.wait (!%p1725_p10), %s1270_s29, 2048  }
 0x41a   : > { %2126 = vsyncadd (!%p1725_p10), %s1270_s29, 4294965248  ;;  %s1279_s13 = scalar_lea.sflag [#allocation13], %s1269_s8 }
 0x41b   : > { %2128 = dma.done.wait (!%p1725_p10), %s1279_s13, 16  }
 0x41c   : > { %2130 = vsyncadd (!%p1725_p10), %s1279_s13, 4294967280  ;;  %s27_s25 = sadd.s32 1, %s2173_s25   ;;  %s3071_s11 = sld [smem:[#allocation19_spill]] }
 0x41d   : > { %p24_p12 = scmp.ge.s32.totalorder %s27_s25, 8   ;;  %s3072_s17 = sld [smem:[#allocation22_spill]] }
 0x41e   : > { %s3073_s10 = sld [smem:[#allocation23_spill]]  ;;  %s3074_s7 = sld [smem:[#allocation20_spill]] }
 0x41f   : > { %s3075_s28 = sld [smem:[#allocation21_spill]]  ;;  %s3076_s15 = smov %s2137_s16 }
 0x420   : > { %s3078_s18 = smov %s2149_s19  ;;  %s3079_s19 = smov %s2153_s20 }
 0x421   : > { %s3081_s21 = smov %s2165_s23  ;;  %s3082_s22 = smov %s2169_s24 }
 0x422   : > { %s3077_s16 = smov %s3071_s11  ;;  %26 = sbr.rel (!%p24_p12) target bundleno = 13 (0xd), region = 126 }
 0x424   : > { %s3080_s20 = smov %s3073_s10  ;;  %s3083_s23 = smov %s3074_s7 }
 0x425   : > { %s3084_s24 = smov %s3075_s28 }
 0x429   :  { %1283 = vsyncpa [#allocation6], 1 }
 0x42a   :  { %1285 = vsyncpa [#allocation6 + $0x1], 1 }
 0x42b   :  { %1286 = vsyncpa [#allocation9], 1 }
 0x42c   :  { %1288 = vsyncpa [#allocation9 + $0x1], 1 }
 0x42d   :  { %1289 = vsyncpa [#allocation7], 1 }
 0x42e   :  { %1291 = vsyncpa [#allocation7 + $0x1], 1 }
 0x42f   :  { %1292 = vsyncpa [#allocation13], 1 }
 0x430   :  { %1294 = vsyncpa [#allocation13 + $0x1], 1 }

</bundles_post_ra>
